<compile_context>
chip_gen: v5e
topology: v5e:2x2
jax: 0.10.0
libtpu: 0.0.40
codegen_flags: <defaults>
</compile_context>

<pallas_src>
import functools

import jax
import jax.numpy as jnp
from jax.experimental import pallas as pl
from jax.experimental.pallas import tpu as pltpu

# ------------------------- small DistilBERT-like config -------------------------
VOCAB = 100
MAX_POS = 16
HIDDEN = 32
N_HEADS = 4
HEAD_DIM = HIDDEN // N_HEADS
FFN = 4 * HIDDEN          # DistilBERT hidden_dim = 4 * dim
N_LAYERS = 2
LN_EPS = 1e-12            # HF DistilBERT LayerNorm eps


# ------------------------------- fused Pallas kernel ----------------------------
def _layernorm(x, g, b):
    """LayerNorm over last axis (biased variance), gamma/beta of shape (1, H)."""
    mean = jnp.mean(x, axis=-1, keepdims=True)
    var = jnp.mean((x - mean) ** 2, axis=-1, keepdims=True)
    inv = jax.lax.rsqrt(var + LN_EPS)
    return (x - mean) * inv * g + b


def _fused_forward_kernel(
        emb_ref, mask_ref,
        emb_ln_g_ref, emb_ln_b_ref,
        wqkv_ref, bqkv_ref, wo_ref, bo_ref,
        ln1_g_ref, ln1_b_ref,
        w1_ref, b1_ref, w2_ref, b2_ref,
        ln2_g_ref, ln2_b_ref,
        cls_w_ref, cls_b_ref,
        logits_ref, *, batch, seq):
    """Whole DistilBERT-style forward on VMEM-resident activations + weights.

    emb_ref:    (B*S, H)  word+pos embeddings (pre-LayerNorm)
    mask_ref:   (B, 1, S) attention mask (1.0 valid, 0.0 padded)
    per-layer weights are stacked along a leading N_LAYERS axis.
    logits_ref: (B, 1)
    """
    M = batch * seq
    scale = 1.0 / (HEAD_DIM ** 0.5)

    # Embedding LayerNorm (gather + sum done in the wrapper).
    h = _layernorm(emb_ref[...], emb_ln_g_ref[...], emb_ln_b_ref[...])   # (M, H)

    # Additive key-mask bias built in-kernel: 0 for valid keys, -1e30 for pads.
    mask_bias = jnp.where(mask_ref[...] > 0.5, 0.0, -1e30)               # (B, 1, S)

    for l in range(N_LAYERS):   # static unroll; all weights stay in VMEM
        # ---- fused Q/K/V projection: single (M, H) @ (H, 3H) matmul ----
        qkv = jnp.dot(h, wqkv_ref[l],
                      preferred_element_type=jnp.float32) + bqkv_ref[l]  # (M, 3H)
        q_all = qkv[:, :HIDDEN] * scale                                  # scale once
        k_all = qkv[:, HIDDEN:2 * HIDDEN]
        v_all = qkv[:, 2 * HIDDEN:3 * HIDDEN]

        wo_l = wo_ref[l]                                                 # (H, H)
        attn_acc = jnp.zeros((M, HIDDEN), jnp.float32)

        # ---- multi-head attention: heads unrolled, batch handled by einsum ----
        for hd in range(N_HEADS):
            lo = hd * HEAD_DIM
            q3 = q_all[:, lo:lo + HEAD_DIM].reshape(batch, seq, HEAD_DIM)
            k3 = k_all[:, lo:lo + HEAD_DIM].reshape(batch, seq, HEAD_DIM)
            v3 = v_all[:, lo:lo + HEAD_DIM].reshape(batch, seq, HEAD_DIM)

            s = jnp.einsum('bqd,bkd->bqk', q3, k3,
                           preferred_element_type=jnp.float32)           # (B, S, S)
            s = s + mask_bias                                            # key masking
            s = s - jnp.max(s, axis=-1, keepdims=True)
            p = jnp.exp(s)
            p = p * pl.reciprocal(jnp.sum(p, axis=-1, keepdims=True), approx=True)
            ctx = jnp.einsum('bqk,bkd->bqd', p, v3,
                             preferred_element_type=jnp.float32)         # (B, S, dh)

            # Head merge fused into the output projection: accumulate
            # ctx_h @ Wo[rows of this head] instead of concatenating heads.
            attn_acc = attn_acc + jnp.dot(
                ctx.reshape(M, HEAD_DIM), wo_l[lo:lo + HEAD_DIM, :],
                preferred_element_type=jnp.float32)

        attn_out = attn_acc + bo_ref[l]
        h = _layernorm(attn_out + h, ln1_g_ref[l], ln1_b_ref[l])

        # ---- feed-forward ----
        ff = jnp.dot(h, w1_ref[l], preferred_element_type=jnp.float32) + b1_ref[l]
        # TODO(synk): HF DistilBERT uses exact erf-GELU; tanh approximation kept
        # for Mosaic-safe lowering.
        ff = jax.nn.gelu(ff, approximate=True)
        ff = jnp.dot(ff, w2_ref[l], preferred_element_type=jnp.float32) + b2_ref[l]
        h = _layernorm(ff + h, ln2_g_ref[l], ln2_b_ref[l])

    # ---- classifier head on the CLS (first) token of each sequence ----
    cls = jnp.concatenate(
        [h[b * seq:b * seq + 1, :] for b in range(batch)], axis=0)       # (B, H)
    logits = jnp.dot(cls, cls_w_ref[...],
                     preferred_element_type=jnp.float32) + cls_b_ref[...]
    logits_ref[...] = logits


# ------------------------------ parameters (synthetic) --------------------------
def init_params(key):
    keys = iter(jax.random.split(key, 16))

    def nrm(shape):
        return (0.02 * jax.random.normal(next(keys), shape)).astype(jnp.float32)

    zeros = lambda s: jnp.zeros(s, jnp.float32)
    ones = lambda s: jnp.ones(s, jnp.float32)

    return {
        "word_emb": nrm((VOCAB, HIDDEN)),
        "pos_emb": nrm((MAX_POS, HIDDEN)),
        "emb_ln_g": ones((1, HIDDEN)),
        "emb_ln_b": zeros((1, HIDDEN)),
        # Q/K/V fused into one (H, 3H) weight per layer; layers stacked along a
        # leading axis so the whole parameter set is a single VMEM resident.
        "wqkv": nrm((N_LAYERS, HIDDEN, 3 * HIDDEN)),
        "bqkv": zeros((N_LAYERS, 1, 3 * HIDDEN)),
        "wo": nrm((N_LAYERS, HIDDEN, HIDDEN)),
        "bo": zeros((N_LAYERS, 1, HIDDEN)),
        "ln1_g": ones((N_LAYERS, 1, HIDDEN)),
        "ln1_b": zeros((N_LAYERS, 1, HIDDEN)),
        "w1": nrm((N_LAYERS, HIDDEN, FFN)),
        "b1": zeros((N_LAYERS, 1, FFN)),
        "w2": nrm((N_LAYERS, FFN, HIDDEN)),
        "b2": zeros((N_LAYERS, 1, HIDDEN)),
        "ln2_g": ones((N_LAYERS, 1, HIDDEN)),
        "ln2_b": zeros((N_LAYERS, 1, HIDDEN)),
        "cls_w": nrm((HIDDEN, 1)),
        "cls_b": zeros((1, 1)),
    }


# ----------------------------------- forward ------------------------------------
def forward(params, input_ids, attention_mask):
    """Mirrors DistilBertBinaryClassifier.forward: returns logits (B, 1)."""
    B, S = input_ids.shape
    M = B * S

    # Glue: embedding gather + pos add (fuses in XLA); everything else is
    # one fused Pallas kernel.
    word = params["word_emb"][input_ids]                        # (B, S, H)
    pos = params["pos_emb"][:S][None, :, :]                     # (1, S, H)
    emb = (word + pos).reshape(M, HIDDEN).astype(jnp.float32)
    mask = attention_mask.astype(jnp.float32).reshape(B, 1, S)  # bias built in-kernel

    kernel = functools.partial(_fused_forward_kernel, batch=B, seq=S)
    logits = pl.pallas_call(
        kernel,
        out_shape=jax.ShapeDtypeStruct((B, 1), jnp.float32),
        compiler_params=pltpu.CompilerParams(vmem_limit_bytes=32 * 1024 * 1024),
    )(emb, mask,
      params["emb_ln_g"], params["emb_ln_b"],
      params["wqkv"], params["bqkv"], params["wo"], params["bo"],
      params["ln1_g"], params["ln1_b"],
      params["w1"], params["b1"], params["w2"], params["b2"],
      params["ln2_g"], params["ln2_b"],
      params["cls_w"], params["cls_b"])
    return logits


# ------------------------------------- main --------------------------------------
if __name__ == "__main__":
    key = jax.random.PRNGKey(0)
    k_ids, k_params = jax.random.split(key)

    B, S = 2, 8
    input_ids = jax.random.randint(k_ids, (B, S), 0, VOCAB, dtype=jnp.int32)
    attention_mask = jnp.ones((B, S), jnp.int32).at[1, 6:].set(0)  # pad last 2 tokens

    params = init_params(k_params)

    logits = jax.jit(forward)(params, input_ids, attention_mask)
    jax.block_until_ready(logits)

    assert logits.shape == (B, 1) and logits.dtype == jnp.float32
    assert bool(jnp.all(jnp.isfinite(logits)))
    print("KERNEL_OK")
</pallas_src>

<mosaic_0001>
module attributes {stable_mosaic.version = 11 : i64} {
  func.func @_fused_forward_kernel(%arg0: memref<16x32xf32, #tpu.memory_space<vmem>>, %arg1: memref<2x1x8xf32, #tpu.memory_space<vmem>>, %arg2: memref<1x32xf32, #tpu.memory_space<vmem>>, %arg3: memref<1x32xf32, #tpu.memory_space<vmem>>, %arg4: memref<2x32x96xf32, #tpu.memory_space<vmem>>, %arg5: memref<2x1x96xf32, #tpu.memory_space<vmem>>, %arg6: memref<2x32x32xf32, #tpu.memory_space<vmem>>, %arg7: memref<2x1x32xf32, #tpu.memory_space<vmem>>, %arg8: memref<2x1x32xf32, #tpu.memory_space<vmem>>, %arg9: memref<2x1x32xf32, #tpu.memory_space<vmem>>, %arg10: memref<2x32x128xf32, #tpu.memory_space<vmem>>, %arg11: memref<2x1x128xf32, #tpu.memory_space<vmem>>, %arg12: memref<2x128x32xf32, #tpu.memory_space<vmem>>, %arg13: memref<2x1x32xf32, #tpu.memory_space<vmem>>, %arg14: memref<2x1x32xf32, #tpu.memory_space<vmem>>, %arg15: memref<2x1x32xf32, #tpu.memory_space<vmem>>, %arg16: memref<32x1xf32, #tpu.memory_space<vmem>>, %arg17: memref<1x1xf32, #tpu.memory_space<vmem>>, %arg18: memref<2x1xf32, #tpu.memory_space<vmem>>) attributes {dimension_semantics = [], scalar_prefetch = 0 : i64, scratch_operands = 0 : i64, tpu.core_type = #tpu.core_type<tc>} {
    %c0 = arith.constant 0 : index
    %c0_0 = arith.constant 0 : index
    %0 = vector.load %arg0[%c0, %c0_0] : memref<16x32xf32, #tpu.memory_space<vmem>>, vector<16x32xf32>
    %c0_1 = arith.constant 0 : index
    %c0_2 = arith.constant 0 : index
    %1 = vector.load %arg2[%c0_1, %c0_2] : memref<1x32xf32, #tpu.memory_space<vmem>>, vector<1x32xf32>
    %c0_3 = arith.constant 0 : index
    %c0_4 = arith.constant 0 : index
    %2 = vector.load %arg3[%c0_3, %c0_4] : memref<1x32xf32, #tpu.memory_space<vmem>>, vector<1x32xf32>
    %cst = arith.constant dense<0.000000e+00> : vector<16xf32>
    %3 = vector.multi_reduction <add>, %0, %cst [1] : vector<16x32xf32> to vector<16xf32>
    %4 = vector.shape_cast %3 : vector<16xf32> to vector<16x1xf32>
    %cst_5 = arith.constant 3.200000e+01 : f32
    %5 = vector.broadcast %cst_5 : f32 to vector<16x1xf32>
    %6 = arith.divf %4, %5 : vector<16x1xf32>
    %7 = vector.broadcast %6 : vector<16x1xf32> to vector<16x32xf32>
    %8 = arith.subf %0, %7 : vector<16x32xf32>
    %9 = arith.mulf %8, %8 : vector<16x32xf32>
    %cst_6 = arith.constant dense<0.000000e+00> : vector<16xf32>
    %10 = vector.multi_reduction <add>, %9, %cst_6 [1] : vector<16x32xf32> to vector<16xf32>
    %11 = vector.shape_cast %10 : vector<16xf32> to vector<16x1xf32>
    %cst_7 = arith.constant 3.200000e+01 : f32
    %12 = vector.broadcast %cst_7 : f32 to vector<16x1xf32>
    %13 = arith.divf %11, %12 : vector<16x1xf32>
    %cst_8 = arith.constant 9.99999996E-13 : f32
    %14 = vector.broadcast %cst_8 : f32 to vector<16x1xf32>
    %15 = arith.addf %13, %14 : vector<16x1xf32>
    %16 = math.rsqrt %15 : vector<16x1xf32>
    %17 = vector.broadcast %6 : vector<16x1xf32> to vector<16x32xf32>
    %18 = arith.subf %0, %17 : vector<16x32xf32>
    %19 = vector.broadcast %16 : vector<16x1xf32> to vector<16x32xf32>
    %20 = arith.mulf %18, %19 : vector<16x32xf32>
    %21 = vector.broadcast %1 : vector<1x32xf32> to vector<16x32xf32>
    %22 = arith.mulf %20, %21 : vector<16x32xf32>
    %23 = vector.broadcast %2 : vector<1x32xf32> to vector<16x32xf32>
    %24 = arith.addf %22, %23 : vector<16x32xf32>
    %c0_9 = arith.constant 0 : index
    %c0_10 = arith.constant 0 : index
    %c0_11 = arith.constant 0 : index
    %25 = vector.load %arg1[%c0_9, %c0_10, %c0_11] : memref<2x1x8xf32, #tpu.memory_space<vmem>>, vector<2x1x8xf32>
    %cst_12 = arith.constant 5.000000e-01 : f32
    %26 = vector.broadcast %cst_12 : f32 to vector<2x1x8xf32>
    %27 = arith.cmpf ogt, %25, %26 : vector<2x1x8xf32>
    %cst_13 = arith.constant 0.000000e+00 : f32
    %cst_14 = arith.constant -1.000000e+30 : f32
    %28 = vector.broadcast %cst_13 : f32 to vector<2x1x8xf32>
    %29 = vector.broadcast %cst_14 : f32 to vector<2x1x8xf32>
    %30 = arith.select %27, %28, %29 : vector<2x1x8xi1>, vector<2x1x8xf32>
    %c0_15 = arith.constant 0 : index
    %c0_16 = arith.constant 0 : index
    %c0_17 = arith.constant 0 : index
    %31 = vector.load %arg4[%c0_15, %c0_16, %c0_17] : memref<2x32x96xf32, #tpu.memory_space<vmem>>, vector<1x32x96xf32>
    %32 = vector.shape_cast %31 : vector<1x32x96xf32> to vector<32x96xf32>
    %cst_18 = arith.constant dense<0.000000e+00> : vector<16x96xf32>
    %33 = tpu.matmul %24, %32, %cst_18 {dimension_numbers = #tpu.dot_dimension_numbers<[1], [0], [0], [1], [0, 0, 1, 1], [], []>} : vector<16x32xf32>, vector<32x96xf32>, vector<16x96xf32> -> vector<16x96xf32>
    %c0_19 = arith.constant 0 : index
    %c0_20 = arith.constant 0 : index
    %c0_21 = arith.constant 0 : index
    %34 = vector.load %arg5[%c0_19, %c0_20, %c0_21] : memref<2x1x96xf32, #tpu.memory_space<vmem>>, vector<1x1x96xf32>
    %35 = vector.shape_cast %34 : vector<1x1x96xf32> to vector<1x96xf32>
    %36 = vector.broadcast %35 : vector<1x96xf32> to vector<16x96xf32>
    %37 = arith.addf %33, %36 : vector<16x96xf32>
    %38 = vector.extract_strided_slice %37 {offsets = [0, 0], sizes = [16, 32], strides = [1, 1]} : vector<16x96xf32> to vector<16x32xf32>
    %cst_22 = arith.constant 0.353553385 : f32
    %39 = vector.broadcast %cst_22 : f32 to vector<16x32xf32>
    %40 = arith.mulf %38, %39 : vector<16x32xf32>
    %41 = vector.extract_strided_slice %37 {offsets = [0, 32], sizes = [16, 32], strides = [1, 1]} : vector<16x96xf32> to vector<16x32xf32>
    %42 = vector.extract_strided_slice %37 {offsets = [0, 64], sizes = [16, 32], strides = [1, 1]} : vector<16x96xf32> to vector<16x32xf32>
    %c0_23 = arith.constant 0 : index
    %c0_24 = arith.constant 0 : index
    %c0_25 = arith.constant 0 : index
    %43 = vector.load %arg6[%c0_23, %c0_24, %c0_25] : memref<2x32x32xf32, #tpu.memory_space<vmem>>, vector<1x32x32xf32>
    %44 = vector.shape_cast %43 : vector<1x32x32xf32> to vector<32x32xf32>
    %cst_26 = arith.constant 0.000000e+00 : f32
    %45 = vector.broadcast %cst_26 : f32 to vector<16x32xf32>
    %46 = vector.extract_strided_slice %40 {offsets = [0, 0], sizes = [16, 8], strides = [1, 1]} : vector<16x32xf32> to vector<16x8xf32>
    %47 = vector.shape_cast %46 : vector<16x8xf32> to vector<2x8x8xf32>
    %48 = vector.extract_strided_slice %41 {offsets = [0, 0], sizes = [16, 8], strides = [1, 1]} : vector<16x32xf32> to vector<16x8xf32>
    %49 = vector.shape_cast %48 : vector<16x8xf32> to vector<2x8x8xf32>
    %50 = vector.extract_strided_slice %42 {offsets = [0, 0], sizes = [16, 8], strides = [1, 1]} : vector<16x32xf32> to vector<16x8xf32>
    %51 = vector.shape_cast %50 : vector<16x8xf32> to vector<2x8x8xf32>
    "tpu.trace_start"() <{level = 10 : i32, message = "bqd,bkd->bqk"}> : () -> ()
    %cst_27 = arith.constant dense<0.000000e+00> : vector<2x8x8xf32>
    %52 = tpu.matmul %47, %49, %cst_27 {dimension_numbers = #tpu.dot_dimension_numbers<[2], [2], [1], [1], [0, 0, 0, 1, 1, 1], [0], [0]>} : vector<2x8x8xf32>, vector<2x8x8xf32>, vector<2x8x8xf32> -> vector<2x8x8xf32>
    "tpu.trace_stop"() : () -> ()
    %53 = vector.broadcast %30 : vector<2x1x8xf32> to vector<2x8x8xf32>
    %54 = arith.addf %52, %53 : vector<2x8x8xf32>
    %cst_28 = arith.constant dense<0xFF800000> : vector<2x8xf32>
    %55 = vector.multi_reduction <maximumf>, %54, %cst_28 [2] : vector<2x8x8xf32> to vector<2x8xf32>
    %56 = vector.shape_cast %55 : vector<2x8xf32> to vector<2x8x1xf32>
    %57 = vector.broadcast %56 : vector<2x8x1xf32> to vector<2x8x8xf32>
    %58 = arith.subf %54, %57 : vector<2x8x8xf32>
    %59 = math.exp %58 : vector<2x8x8xf32>
    %cst_29 = arith.constant dense<0.000000e+00> : vector<2x8xf32>
    %60 = vector.multi_reduction <add>, %59, %cst_29 [2] : vector<2x8x8xf32> to vector<2x8xf32>
    %61 = vector.shape_cast %60 : vector<2x8xf32> to vector<2x8x1xf32>
    %62 = tpu.reciprocal %61 {approx = true} : vector<2x8x1xf32> -> vector<2x8x1xf32>
    %63 = vector.broadcast %62 : vector<2x8x1xf32> to vector<2x8x8xf32>
    %64 = arith.mulf %59, %63 : vector<2x8x8xf32>
    "tpu.trace_start"() <{level = 10 : i32, message = "bqk,bkd->bqd"}> : () -> ()
    %cst_30 = arith.constant dense<0.000000e+00> : vector<2x8x8xf32>
    %65 = tpu.matmul %64, %51, %cst_30 {dimension_numbers = #tpu.dot_dimension_numbers<[2], [1], [1], [2], [0, 0, 0, 1, 1, 2], [0], [0]>} : vector<2x8x8xf32>, vector<2x8x8xf32>, vector<2x8x8xf32> -> vector<2x8x8xf32>
    "tpu.trace_stop"() : () -> ()
    %66 = vector.shape_cast %65 : vector<2x8x8xf32> to vector<16x8xf32>
    %67 = vector.extract_strided_slice %44 {offsets = [0, 0], sizes = [8, 32], strides = [1, 1]} : vector<32x32xf32> to vector<8x32xf32>
    %cst_31 = arith.constant dense<0.000000e+00> : vector<16x32xf32>
    %68 = tpu.matmul %66, %67, %cst_31 {dimension_numbers = #tpu.dot_dimension_numbers<[1], [0], [0], [1], [0, 0, 1, 1], [], []>} : vector<16x8xf32>, vector<8x32xf32>, vector<16x32xf32> -> vector<16x32xf32>
    %69 = arith.addf %45, %68 : vector<16x32xf32>
    %70 = vector.extract_strided_slice %40 {offsets = [0, 8], sizes = [16, 8], strides = [1, 1]} : vector<16x32xf32> to vector<16x8xf32>
    %71 = vector.shape_cast %70 : vector<16x8xf32> to vector<2x8x8xf32>
    %72 = vector.extract_strided_slice %41 {offsets = [0, 8], sizes = [16, 8], strides = [1, 1]} : vector<16x32xf32> to vector<16x8xf32>
    %73 = vector.shape_cast %72 : vector<16x8xf32> to vector<2x8x8xf32>
    %74 = vector.extract_strided_slice %42 {offsets = [0, 8], sizes = [16, 8], strides = [1, 1]} : vector<16x32xf32> to vector<16x8xf32>
    %75 = vector.shape_cast %74 : vector<16x8xf32> to vector<2x8x8xf32>
    "tpu.trace_start"() <{level = 10 : i32, message = "bqd,bkd->bqk"}> : () -> ()
    %cst_32 = arith.constant dense<0.000000e+00> : vector<2x8x8xf32>
    %76 = tpu.matmul %71, %73, %cst_32 {dimension_numbers = #tpu.dot_dimension_numbers<[2], [2], [1], [1], [0, 0, 0, 1, 1, 1], [0], [0]>} : vector<2x8x8xf32>, vector<2x8x8xf32>, vector<2x8x8xf32> -> vector<2x8x8xf32>
    "tpu.trace_stop"() : () -> ()
    %77 = vector.broadcast %30 : vector<2x1x8xf32> to vector<2x8x8xf32>
    %78 = arith.addf %76, %77 : vector<2x8x8xf32>
    %cst_33 = arith.constant dense<0xFF800000> : vector<2x8xf32>
    %79 = vector.multi_reduction <maximumf>, %78, %cst_33 [2] : vector<2x8x8xf32> to vector<2x8xf32>
    %80 = vector.shape_cast %79 : vector<2x8xf32> to vector<2x8x1xf32>
    %81 = vector.broadcast %80 : vector<2x8x1xf32> to vector<2x8x8xf32>
    %82 = arith.subf %78, %81 : vector<2x8x8xf32>
    %83 = math.exp %82 : vector<2x8x8xf32>
    %cst_34 = arith.constant dense<0.000000e+00> : vector<2x8xf32>
    %84 = vector.multi_reduction <add>, %83, %cst_34 [2] : vector<2x8x8xf32> to vector<2x8xf32>
    %85 = vector.shape_cast %84 : vector<2x8xf32> to vector<2x8x1xf32>
    %86 = tpu.reciprocal %85 {approx = true} : vector<2x8x1xf32> -> vector<2x8x1xf32>
    %87 = vector.broadcast %86 : vector<2x8x1xf32> to vector<2x8x8xf32>
    %88 = arith.mulf %83, %87 : vector<2x8x8xf32>
    "tpu.trace_start"() <{level = 10 : i32, message = "bqk,bkd->bqd"}> : () -> ()
    %cst_35 = arith.constant dense<0.000000e+00> : vector<2x8x8xf32>
    %89 = tpu.matmul %88, %75, %cst_35 {dimension_numbers = #tpu.dot_dimension_numbers<[2], [1], [1], [2], [0, 0, 0, 1, 1, 2], [0], [0]>} : vector<2x8x8xf32>, vector<2x8x8xf32>, vector<2x8x8xf32> -> vector<2x8x8xf32>
    "tpu.trace_stop"() : () -> ()
    %90 = vector.shape_cast %89 : vector<2x8x8xf32> to vector<16x8xf32>
    %91 = vector.extract_strided_slice %44 {offsets = [8, 0], sizes = [8, 32], strides = [1, 1]} : vector<32x32xf32> to vector<8x32xf32>
    %cst_36 = arith.constant dense<0.000000e+00> : vector<16x32xf32>
    %92 = tpu.matmul %90, %91, %cst_36 {dimension_numbers = #tpu.dot_dimension_numbers<[1], [0], [0], [1], [0, 0, 1, 1], [], []>} : vector<16x8xf32>, vector<8x32xf32>, vector<16x32xf32> -> vector<16x32xf32>
    %93 = arith.addf %69, %92 : vector<16x32xf32>
    %94 = vector.extract_strided_slice %40 {offsets = [0, 16], sizes = [16, 8], strides = [1, 1]} : vector<16x32xf32> to vector<16x8xf32>
    %95 = vector.shape_cast %94 : vector<16x8xf32> to vector<2x8x8xf32>
    %96 = vector.extract_strided_slice %41 {offsets = [0, 16], sizes = [16, 8], strides = [1, 1]} : vector<16x32xf32> to vector<16x8xf32>
    %97 = vector.shape_cast %96 : vector<16x8xf32> to vector<2x8x8xf32>
    %98 = vector.extract_strided_slice %42 {offsets = [0, 16], sizes = [16, 8], strides = [1, 1]} : vector<16x32xf32> to vector<16x8xf32>
    %99 = vector.shape_cast %98 : vector<16x8xf32> to vector<2x8x8xf32>
    "tpu.trace_start"() <{level = 10 : i32, message = "bqd,bkd->bqk"}> : () -> ()
    %cst_37 = arith.constant dense<0.000000e+00> : vector<2x8x8xf32>
    %100 = tpu.matmul %95, %97, %cst_37 {dimension_numbers = #tpu.dot_dimension_numbers<[2], [2], [1], [1], [0, 0, 0, 1, 1, 1], [0], [0]>} : vector<2x8x8xf32>, vector<2x8x8xf32>, vector<2x8x8xf32> -> vector<2x8x8xf32>
    "tpu.trace_stop"() : () -> ()
    %101 = vector.broadcast %30 : vector<2x1x8xf32> to vector<2x8x8xf32>
    %102 = arith.addf %100, %101 : vector<2x8x8xf32>
    %cst_38 = arith.constant dense<0xFF800000> : vector<2x8xf32>
    %103 = vector.multi_reduction <maximumf>, %102, %cst_38 [2] : vector<2x8x8xf32> to vector<2x8xf32>
    %104 = vector.shape_cast %103 : vector<2x8xf32> to vector<2x8x1xf32>
    %105 = vector.broadcast %104 : vector<2x8x1xf32> to vector<2x8x8xf32>
    %106 = arith.subf %102, %105 : vector<2x8x8xf32>
    %107 = math.exp %106 : vector<2x8x8xf32>
    %cst_39 = arith.constant dense<0.000000e+00> : vector<2x8xf32>
    %108 = vector.multi_reduction <add>, %107, %cst_39 [2] : vector<2x8x8xf32> to vector<2x8xf32>
    %109 = vector.shape_cast %108 : vector<2x8xf32> to vector<2x8x1xf32>
    %110 = tpu.reciprocal %109 {approx = true} : vector<2x8x1xf32> -> vector<2x8x1xf32>
    %111 = vector.broadcast %110 : vector<2x8x1xf32> to vector<2x8x8xf32>
    %112 = arith.mulf %107, %111 : vector<2x8x8xf32>
    "tpu.trace_start"() <{level = 10 : i32, message = "bqk,bkd->bqd"}> : () -> ()
    %cst_40 = arith.constant dense<0.000000e+00> : vector<2x8x8xf32>
    %113 = tpu.matmul %112, %99, %cst_40 {dimension_numbers = #tpu.dot_dimension_numbers<[2], [1], [1], [2], [0, 0, 0, 1, 1, 2], [0], [0]>} : vector<2x8x8xf32>, vector<2x8x8xf32>, vector<2x8x8xf32> -> vector<2x8x8xf32>
    "tpu.trace_stop"() : () -> ()
    %114 = vector.shape_cast %113 : vector<2x8x8xf32> to vector<16x8xf32>
    %115 = vector.extract_strided_slice %44 {offsets = [16, 0], sizes = [8, 32], strides = [1, 1]} : vector<32x32xf32> to vector<8x32xf32>
    %cst_41 = arith.constant dense<0.000000e+00> : vector<16x32xf32>
    %116 = tpu.matmul %114, %115, %cst_41 {dimension_numbers = #tpu.dot_dimension_numbers<[1], [0], [0], [1], [0, 0, 1, 1], [], []>} : vector<16x8xf32>, vector<8x32xf32>, vector<16x32xf32> -> vector<16x32xf32>
    %117 = arith.addf %93, %116 : vector<16x32xf32>
    %118 = vector.extract_strided_slice %40 {offsets = [0, 24], sizes = [16, 8], strides = [1, 1]} : vector<16x32xf32> to vector<16x8xf32>
    %119 = vector.shape_cast %118 : vector<16x8xf32> to vector<2x8x8xf32>
    %120 = vector.extract_strided_slice %41 {offsets = [0, 24], sizes = [16, 8], strides = [1, 1]} : vector<16x32xf32> to vector<16x8xf32>
    %121 = vector.shape_cast %120 : vector<16x8xf32> to vector<2x8x8xf32>
    %122 = vector.extract_strided_slice %42 {offsets = [0, 24], sizes = [16, 8], strides = [1, 1]} : vector<16x32xf32> to vector<16x8xf32>
    %123 = vector.shape_cast %122 : vector<16x8xf32> to vector<2x8x8xf32>
    "tpu.trace_start"() <{level = 10 : i32, message = "bqd,bkd->bqk"}> : () -> ()
    %cst_42 = arith.constant dense<0.000000e+00> : vector<2x8x8xf32>
    %124 = tpu.matmul %119, %121, %cst_42 {dimension_numbers = #tpu.dot_dimension_numbers<[2], [2], [1], [1], [0, 0, 0, 1, 1, 1], [0], [0]>} : vector<2x8x8xf32>, vector<2x8x8xf32>, vector<2x8x8xf32> -> vector<2x8x8xf32>
    "tpu.trace_stop"() : () -> ()
    %125 = vector.broadcast %30 : vector<2x1x8xf32> to vector<2x8x8xf32>
    %126 = arith.addf %124, %125 : vector<2x8x8xf32>
    %cst_43 = arith.constant dense<0xFF800000> : vector<2x8xf32>
    %127 = vector.multi_reduction <maximumf>, %126, %cst_43 [2] : vector<2x8x8xf32> to vector<2x8xf32>
    %128 = vector.shape_cast %127 : vector<2x8xf32> to vector<2x8x1xf32>
    %129 = vector.broadcast %128 : vector<2x8x1xf32> to vector<2x8x8xf32>
    %130 = arith.subf %126, %129 : vector<2x8x8xf32>
    %131 = math.exp %130 : vector<2x8x8xf32>
    %cst_44 = arith.constant dense<0.000000e+00> : vector<2x8xf32>
    %132 = vector.multi_reduction <add>, %131, %cst_44 [2] : vector<2x8x8xf32> to vector<2x8xf32>
    %133 = vector.shape_cast %132 : vector<2x8xf32> to vector<2x8x1xf32>
    %134 = tpu.reciprocal %133 {approx = true} : vector<2x8x1xf32> -> vector<2x8x1xf32>
    %135 = vector.broadcast %134 : vector<2x8x1xf32> to vector<2x8x8xf32>
    %136 = arith.mulf %131, %135 : vector<2x8x8xf32>
    "tpu.trace_start"() <{level = 10 : i32, message = "bqk,bkd->bqd"}> : () -> ()
    %cst_45 = arith.constant dense<0.000000e+00> : vector<2x8x8xf32>
    %137 = tpu.matmul %136, %123, %cst_45 {dimension_numbers = #tpu.dot_dimension_numbers<[2], [1], [1], [2], [0, 0, 0, 1, 1, 2], [0], [0]>} : vector<2x8x8xf32>, vector<2x8x8xf32>, vector<2x8x8xf32> -> vector<2x8x8xf32>
    "tpu.trace_stop"() : () -> ()
    %138 = vector.shape_cast %137 : vector<2x8x8xf32> to vector<16x8xf32>
    %139 = vector.extract_strided_slice %44 {offsets = [24, 0], sizes = [8, 32], strides = [1, 1]} : vector<32x32xf32> to vector<8x32xf32>
    %cst_46 = arith.constant dense<0.000000e+00> : vector<16x32xf32>
    %140 = tpu.matmul %138, %139, %cst_46 {dimension_numbers = #tpu.dot_dimension_numbers<[1], [0], [0], [1], [0, 0, 1, 1], [], []>} : vector<16x8xf32>, vector<8x32xf32>, vector<16x32xf32> -> vector<16x32xf32>
    %141 = arith.addf %117, %140 : vector<16x32xf32>
    %c0_47 = arith.constant 0 : index
    %c0_48 = arith.constant 0 : index
    %c0_49 = arith.constant 0 : index
    %142 = vector.load %arg7[%c0_47, %c0_48, %c0_49] : memref<2x1x32xf32, #tpu.memory_space<vmem>>, vector<1x1x32xf32>
    %143 = vector.shape_cast %142 : vector<1x1x32xf32> to vector<1x32xf32>
    %144 = vector.broadcast %143 : vector<1x32xf32> to vector<16x32xf32>
    %145 = arith.addf %141, %144 : vector<16x32xf32>
    %146 = arith.addf %145, %24 : vector<16x32xf32>
    %c0_50 = arith.constant 0 : index
    %c0_51 = arith.constant 0 : index
    %c0_52 = arith.constant 0 : index
    %147 = vector.load %arg8[%c0_50, %c0_51, %c0_52] : memref<2x1x32xf32, #tpu.memory_space<vmem>>, vector<1x1x32xf32>
    %148 = vector.shape_cast %147 : vector<1x1x32xf32> to vector<1x32xf32>
    %c0_53 = arith.constant 0 : index
    %c0_54 = arith.constant 0 : index
    %c0_55 = arith.constant 0 : index
    %149 = vector.load %arg9[%c0_53, %c0_54, %c0_55] : memref<2x1x32xf32, #tpu.memory_space<vmem>>, vector<1x1x32xf32>
    %150 = vector.shape_cast %149 : vector<1x1x32xf32> to vector<1x32xf32>
    %cst_56 = arith.constant dense<0.000000e+00> : vector<16xf32>
    %151 = vector.multi_reduction <add>, %146, %cst_56 [1] : vector<16x32xf32> to vector<16xf32>
    %152 = vector.shape_cast %151 : vector<16xf32> to vector<16x1xf32>
    %cst_57 = arith.constant 3.200000e+01 : f32
    %153 = vector.broadcast %cst_57 : f32 to vector<16x1xf32>
    %154 = arith.divf %152, %153 : vector<16x1xf32>
    %155 = vector.broadcast %154 : vector<16x1xf32> to vector<16x32xf32>
    %156 = arith.subf %146, %155 : vector<16x32xf32>
    %157 = arith.mulf %156, %156 : vector<16x32xf32>
    %cst_58 = arith.constant dense<0.000000e+00> : vector<16xf32>
    %158 = vector.multi_reduction <add>, %157, %cst_58 [1] : vector<16x32xf32> to vector<16xf32>
    %159 = vector.shape_cast %158 : vector<16xf32> to vector<16x1xf32>
    %cst_59 = arith.constant 3.200000e+01 : f32
    %160 = vector.broadcast %cst_59 : f32 to vector<16x1xf32>
    %161 = arith.divf %159, %160 : vector<16x1xf32>
    %cst_60 = arith.constant 9.99999996E-13 : f32
    %162 = vector.broadcast %cst_60 : f32 to vector<16x1xf32>
    %163 = arith.addf %161, %162 : vector<16x1xf32>
    %164 = math.rsqrt %163 : vector<16x1xf32>
    %165 = vector.broadcast %154 : vector<16x1xf32> to vector<16x32xf32>
    %166 = arith.subf %146, %165 : vector<16x32xf32>
    %167 = vector.broadcast %164 : vector<16x1xf32> to vector<16x32xf32>
    %168 = arith.mulf %166, %167 : vector<16x32xf32>
    %169 = vector.broadcast %148 : vector<1x32xf32> to vector<16x32xf32>
    %170 = arith.mulf %168, %169 : vector<16x32xf32>
    %171 = vector.broadcast %150 : vector<1x32xf32> to vector<16x32xf32>
    %172 = arith.addf %170, %171 : vector<16x32xf32>
    %c0_61 = arith.constant 0 : index
    %c0_62 = arith.constant 0 : index
    %c0_63 = arith.constant 0 : index
    %173 = vector.load %arg10[%c0_61, %c0_62, %c0_63] : memref<2x32x128xf32, #tpu.memory_space<vmem>>, vector<1x32x128xf32>
    %174 = vector.shape_cast %173 : vector<1x32x128xf32> to vector<32x128xf32>
    %cst_64 = arith.constant dense<0.000000e+00> : vector<16x128xf32>
    %175 = tpu.matmul %172, %174, %cst_64 {dimension_numbers = #tpu.dot_dimension_numbers<[1], [0], [0], [1], [0, 0, 1, 1], [], []>} : vector<16x32xf32>, vector<32x128xf32>, vector<16x128xf32> -> vector<16x128xf32>
    %c0_65 = arith.constant 0 : index
    %c0_66 = arith.constant 0 : index
    %c0_67 = arith.constant 0 : index
    %176 = vector.load %arg11[%c0_65, %c0_66, %c0_67] : memref<2x1x128xf32, #tpu.memory_space<vmem>>, vector<1x1x128xf32>
    %177 = vector.shape_cast %176 : vector<1x1x128xf32> to vector<1x128xf32>
    %178 = vector.broadcast %177 : vector<1x128xf32> to vector<16x128xf32>
    %179 = arith.addf %175, %178 : vector<16x128xf32>
    %180 = arith.mulf %179, %179 : vector<16x128xf32>
    %181 = arith.mulf %179, %180 : vector<16x128xf32>
    %cst_68 = arith.constant 4.471500e-02 : f32
    %182 = vector.broadcast %cst_68 : f32 to vector<16x128xf32>
    %183 = arith.mulf %182, %181 : vector<16x128xf32>
    %184 = arith.addf %179, %183 : vector<16x128xf32>
    %cst_69 = arith.constant 0.797884583 : f32
    %185 = vector.broadcast %cst_69 : f32 to vector<16x128xf32>
    %186 = arith.mulf %185, %184 : vector<16x128xf32>
    %187 = math.tanh %186 : vector<16x128xf32>
    %cst_70 = arith.constant 1.000000e+00 : f32
    %188 = vector.broadcast %cst_70 : f32 to vector<16x128xf32>
    %189 = arith.addf %188, %187 : vector<16x128xf32>
    %cst_71 = arith.constant 5.000000e-01 : f32
    %190 = vector.broadcast %cst_71 : f32 to vector<16x128xf32>
    %191 = arith.mulf %190, %189 : vector<16x128xf32>
    %192 = arith.mulf %179, %191 : vector<16x128xf32>
    %c0_72 = arith.constant 0 : index
    %c0_73 = arith.constant 0 : index
    %c0_74 = arith.constant 0 : index
    %193 = vector.load %arg12[%c0_72, %c0_73, %c0_74] : memref<2x128x32xf32, #tpu.memory_space<vmem>>, vector<1x128x32xf32>
    %194 = vector.shape_cast %193 : vector<1x128x32xf32> to vector<128x32xf32>
    %cst_75 = arith.constant dense<0.000000e+00> : vector<16x32xf32>
    %195 = tpu.matmul %192, %194, %cst_75 {dimension_numbers = #tpu.dot_dimension_numbers<[1], [0], [0], [1], [0, 0, 1, 1], [], []>} : vector<16x128xf32>, vector<128x32xf32>, vector<16x32xf32> -> vector<16x32xf32>
    %c0_76 = arith.constant 0 : index
    %c0_77 = arith.constant 0 : index
    %c0_78 = arith.constant 0 : index
    %196 = vector.load %arg13[%c0_76, %c0_77, %c0_78] : memref<2x1x32xf32, #tpu.memory_space<vmem>>, vector<1x1x32xf32>
    %197 = vector.shape_cast %196 : vector<1x1x32xf32> to vector<1x32xf32>
    %198 = vector.broadcast %197 : vector<1x32xf32> to vector<16x32xf32>
    %199 = arith.addf %195, %198 : vector<16x32xf32>
    %200 = arith.addf %199, %172 : vector<16x32xf32>
    %c0_79 = arith.constant 0 : index
    %c0_80 = arith.constant 0 : index
    %c0_81 = arith.constant 0 : index
    %201 = vector.load %arg14[%c0_79, %c0_80, %c0_81] : memref<2x1x32xf32, #tpu.memory_space<vmem>>, vector<1x1x32xf32>
    %202 = vector.shape_cast %201 : vector<1x1x32xf32> to vector<1x32xf32>
    %c0_82 = arith.constant 0 : index
    %c0_83 = arith.constant 0 : index
    %c0_84 = arith.constant 0 : index
    %203 = vector.load %arg15[%c0_82, %c0_83, %c0_84] : memref<2x1x32xf32, #tpu.memory_space<vmem>>, vector<1x1x32xf32>
    %204 = vector.shape_cast %203 : vector<1x1x32xf32> to vector<1x32xf32>
    %cst_85 = arith.constant dense<0.000000e+00> : vector<16xf32>
    %205 = vector.multi_reduction <add>, %200, %cst_85 [1] : vector<16x32xf32> to vector<16xf32>
    %206 = vector.shape_cast %205 : vector<16xf32> to vector<16x1xf32>
    %cst_86 = arith.constant 3.200000e+01 : f32
    %207 = vector.broadcast %cst_86 : f32 to vector<16x1xf32>
    %208 = arith.divf %206, %207 : vector<16x1xf32>
    %209 = vector.broadcast %208 : vector<16x1xf32> to vector<16x32xf32>
    %210 = arith.subf %200, %209 : vector<16x32xf32>
    %211 = arith.mulf %210, %210 : vector<16x32xf32>
    %cst_87 = arith.constant dense<0.000000e+00> : vector<16xf32>
    %212 = vector.multi_reduction <add>, %211, %cst_87 [1] : vector<16x32xf32> to vector<16xf32>
    %213 = vector.shape_cast %212 : vector<16xf32> to vector<16x1xf32>
    %cst_88 = arith.constant 3.200000e+01 : f32
    %214 = vector.broadcast %cst_88 : f32 to vector<16x1xf32>
    %215 = arith.divf %213, %214 : vector<16x1xf32>
    %cst_89 = arith.constant 9.99999996E-13 : f32
    %216 = vector.broadcast %cst_89 : f32 to vector<16x1xf32>
    %217 = arith.addf %215, %216 : vector<16x1xf32>
    %218 = math.rsqrt %217 : vector<16x1xf32>
    %219 = vector.broadcast %208 : vector<16x1xf32> to vector<16x32xf32>
    %220 = arith.subf %200, %219 : vector<16x32xf32>
    %221 = vector.broadcast %218 : vector<16x1xf32> to vector<16x32xf32>
    %222 = arith.mulf %220, %221 : vector<16x32xf32>
    %223 = vector.broadcast %202 : vector<1x32xf32> to vector<16x32xf32>
    %224 = arith.mulf %222, %223 : vector<16x32xf32>
    %225 = vector.broadcast %204 : vector<1x32xf32> to vector<16x32xf32>
    %226 = arith.addf %224, %225 : vector<16x32xf32>
    %c1 = arith.constant 1 : index
    %c0_90 = arith.constant 0 : index
    %c0_91 = arith.constant 0 : index
    %227 = vector.load %arg4[%c1, %c0_90, %c0_91] : memref<2x32x96xf32, #tpu.memory_space<vmem>>, vector<1x32x96xf32>
    %228 = vector.shape_cast %227 : vector<1x32x96xf32> to vector<32x96xf32>
    %cst_92 = arith.constant dense<0.000000e+00> : vector<16x96xf32>
    %229 = tpu.matmul %226, %228, %cst_92 {dimension_numbers = #tpu.dot_dimension_numbers<[1], [0], [0], [1], [0, 0, 1, 1], [], []>} : vector<16x32xf32>, vector<32x96xf32>, vector<16x96xf32> -> vector<16x96xf32>
    %c1_93 = arith.constant 1 : index
    %c0_94 = arith.constant 0 : index
    %c0_95 = arith.constant 0 : index
    %230 = vector.load %arg5[%c1_93, %c0_94, %c0_95] : memref<2x1x96xf32, #tpu.memory_space<vmem>>, vector<1x1x96xf32>
    %231 = vector.shape_cast %230 : vector<1x1x96xf32> to vector<1x96xf32>
    %232 = vector.broadcast %231 : vector<1x96xf32> to vector<16x96xf32>
    %233 = arith.addf %229, %232 : vector<16x96xf32>
    %234 = vector.extract_strided_slice %233 {offsets = [0, 0], sizes = [16, 32], strides = [1, 1]} : vector<16x96xf32> to vector<16x32xf32>
    %cst_96 = arith.constant 0.353553385 : f32
    %235 = vector.broadcast %cst_96 : f32 to vector<16x32xf32>
    %236 = arith.mulf %234, %235 : vector<16x32xf32>
    %237 = vector.extract_strided_slice %233 {offsets = [0, 32], sizes = [16, 32], strides = [1, 1]} : vector<16x96xf32> to vector<16x32xf32>
    %238 = vector.extract_strided_slice %233 {offsets = [0, 64], sizes = [16, 32], strides = [1, 1]} : vector<16x96xf32> to vector<16x32xf32>
    %c1_97 = arith.constant 1 : index
    %c0_98 = arith.constant 0 : index
    %c0_99 = arith.constant 0 : index
    %239 = vector.load %arg6[%c1_97, %c0_98, %c0_99] : memref<2x32x32xf32, #tpu.memory_space<vmem>>, vector<1x32x32xf32>
    %240 = vector.shape_cast %239 : vector<1x32x32xf32> to vector<32x32xf32>
    %cst_100 = arith.constant 0.000000e+00 : f32
    %241 = vector.broadcast %cst_100 : f32 to vector<16x32xf32>
    %242 = vector.extract_strided_slice %236 {offsets = [0, 0], sizes = [16, 8], strides = [1, 1]} : vector<16x32xf32> to vector<16x8xf32>
    %243 = vector.shape_cast %242 : vector<16x8xf32> to vector<2x8x8xf32>
    %244 = vector.extract_strided_slice %237 {offsets = [0, 0], sizes = [16, 8], strides = [1, 1]} : vector<16x32xf32> to vector<16x8xf32>
    %245 = vector.shape_cast %244 : vector<16x8xf32> to vector<2x8x8xf32>
    %246 = vector.extract_strided_slice %238 {offsets = [0, 0], sizes = [16, 8], strides = [1, 1]} : vector<16x32xf32> to vector<16x8xf32>
    %247 = vector.shape_cast %246 : vector<16x8xf32> to vector<2x8x8xf32>
    "tpu.trace_start"() <{level = 10 : i32, message = "bqd,bkd->bqk"}> : () -> ()
    %cst_101 = arith.constant dense<0.000000e+00> : vector<2x8x8xf32>
    %248 = tpu.matmul %243, %245, %cst_101 {dimension_numbers = #tpu.dot_dimension_numbers<[2], [2], [1], [1], [0, 0, 0, 1, 1, 1], [0], [0]>} : vector<2x8x8xf32>, vector<2x8x8xf32>, vector<2x8x8xf32> -> vector<2x8x8xf32>
    "tpu.trace_stop"() : () -> ()
    %249 = vector.broadcast %30 : vector<2x1x8xf32> to vector<2x8x8xf32>
    %250 = arith.addf %248, %249 : vector<2x8x8xf32>
    %cst_102 = arith.constant dense<0xFF800000> : vector<2x8xf32>
    %251 = vector.multi_reduction <maximumf>, %250, %cst_102 [2] : vector<2x8x8xf32> to vector<2x8xf32>
    %252 = vector.shape_cast %251 : vector<2x8xf32> to vector<2x8x1xf32>
    %253 = vector.broadcast %252 : vector<2x8x1xf32> to vector<2x8x8xf32>
    %254 = arith.subf %250, %253 : vector<2x8x8xf32>
    %255 = math.exp %254 : vector<2x8x8xf32>
    %cst_103 = arith.constant dense<0.000000e+00> : vector<2x8xf32>
    %256 = vector.multi_reduction <add>, %255, %cst_103 [2] : vector<2x8x8xf32> to vector<2x8xf32>
    %257 = vector.shape_cast %256 : vector<2x8xf32> to vector<2x8x1xf32>
    %258 = tpu.reciprocal %257 {approx = true} : vector<2x8x1xf32> -> vector<2x8x1xf32>
    %259 = vector.broadcast %258 : vector<2x8x1xf32> to vector<2x8x8xf32>
    %260 = arith.mulf %255, %259 : vector<2x8x8xf32>
    "tpu.trace_start"() <{level = 10 : i32, message = "bqk,bkd->bqd"}> : () -> ()
    %cst_104 = arith.constant dense<0.000000e+00> : vector<2x8x8xf32>
    %261 = tpu.matmul %260, %247, %cst_104 {dimension_numbers = #tpu.dot_dimension_numbers<[2], [1], [1], [2], [0, 0, 0, 1, 1, 2], [0], [0]>} : vector<2x8x8xf32>, vector<2x8x8xf32>, vector<2x8x8xf32> -> vector<2x8x8xf32>
    "tpu.trace_stop"() : () -> ()
    %262 = vector.shape_cast %261 : vector<2x8x8xf32> to vector<16x8xf32>
    %263 = vector.extract_strided_slice %240 {offsets = [0, 0], sizes = [8, 32], strides = [1, 1]} : vector<32x32xf32> to vector<8x32xf32>
    %cst_105 = arith.constant dense<0.000000e+00> : vector<16x32xf32>
    %264 = tpu.matmul %262, %263, %cst_105 {dimension_numbers = #tpu.dot_dimension_numbers<[1], [0], [0], [1], [0, 0, 1, 1], [], []>} : vector<16x8xf32>, vector<8x32xf32>, vector<16x32xf32> -> vector<16x32xf32>
    %265 = arith.addf %241, %264 : vector<16x32xf32>
    %266 = vector.extract_strided_slice %236 {offsets = [0, 8], sizes = [16, 8], strides = [1, 1]} : vector<16x32xf32> to vector<16x8xf32>
    %267 = vector.shape_cast %266 : vector<16x8xf32> to vector<2x8x8xf32>
    %268 = vector.extract_strided_slice %237 {offsets = [0, 8], sizes = [16, 8], strides = [1, 1]} : vector<16x32xf32> to vector<16x8xf32>
    %269 = vector.shape_cast %268 : vector<16x8xf32> to vector<2x8x8xf32>
    %270 = vector.extract_strided_slice %238 {offsets = [0, 8], sizes = [16, 8], strides = [1, 1]} : vector<16x32xf32> to vector<16x8xf32>
    %271 = vector.shape_cast %270 : vector<16x8xf32> to vector<2x8x8xf32>
    "tpu.trace_start"() <{level = 10 : i32, message = "bqd,bkd->bqk"}> : () -> ()
    %cst_106 = arith.constant dense<0.000000e+00> : vector<2x8x8xf32>
    %272 = tpu.matmul %267, %269, %cst_106 {dimension_numbers = #tpu.dot_dimension_numbers<[2], [2], [1], [1], [0, 0, 0, 1, 1, 1], [0], [0]>} : vector<2x8x8xf32>, vector<2x8x8xf32>, vector<2x8x8xf32> -> vector<2x8x8xf32>
    "tpu.trace_stop"() : () -> ()
    %273 = vector.broadcast %30 : vector<2x1x8xf32> to vector<2x8x8xf32>
    %274 = arith.addf %272, %273 : vector<2x8x8xf32>
    %cst_107 = arith.constant dense<0xFF800000> : vector<2x8xf32>
    %275 = vector.multi_reduction <maximumf>, %274, %cst_107 [2] : vector<2x8x8xf32> to vector<2x8xf32>
    %276 = vector.shape_cast %275 : vector<2x8xf32> to vector<2x8x1xf32>
    %277 = vector.broadcast %276 : vector<2x8x1xf32> to vector<2x8x8xf32>
    %278 = arith.subf %274, %277 : vector<2x8x8xf32>
    %279 = math.exp %278 : vector<2x8x8xf32>
    %cst_108 = arith.constant dense<0.000000e+00> : vector<2x8xf32>
    %280 = vector.multi_reduction <add>, %279, %cst_108 [2] : vector<2x8x8xf32> to vector<2x8xf32>
    %281 = vector.shape_cast %280 : vector<2x8xf32> to vector<2x8x1xf32>
    %282 = tpu.reciprocal %281 {approx = true} : vector<2x8x1xf32> -> vector<2x8x1xf32>
    %283 = vector.broadcast %282 : vector<2x8x1xf32> to vector<2x8x8xf32>
    %284 = arith.mulf %279, %283 : vector<2x8x8xf32>
    "tpu.trace_start"() <{level = 10 : i32, message = "bqk,bkd->bqd"}> : () -> ()
    %cst_109 = arith.constant dense<0.000000e+00> : vector<2x8x8xf32>
    %285 = tpu.matmul %284, %271, %cst_109 {dimension_numbers = #tpu.dot_dimension_numbers<[2], [1], [1], [2], [0, 0, 0, 1, 1, 2], [0], [0]>} : vector<2x8x8xf32>, vector<2x8x8xf32>, vector<2x8x8xf32> -> vector<2x8x8xf32>
    "tpu.trace_stop"() : () -> ()
    %286 = vector.shape_cast %285 : vector<2x8x8xf32> to vector<16x8xf32>
    %287 = vector.extract_strided_slice %240 {offsets = [8, 0], sizes = [8, 32], strides = [1, 1]} : vector<32x32xf32> to vector<8x32xf32>
    %cst_110 = arith.constant dense<0.000000e+00> : vector<16x32xf32>
    %288 = tpu.matmul %286, %287, %cst_110 {dimension_numbers = #tpu.dot_dimension_numbers<[1], [0], [0], [1], [0, 0, 1, 1], [], []>} : vector<16x8xf32>, vector<8x32xf32>, vector<16x32xf32> -> vector<16x32xf32>
    %289 = arith.addf %265, %288 : vector<16x32xf32>
    %290 = vector.extract_strided_slice %236 {offsets = [0, 16], sizes = [16, 8], strides = [1, 1]} : vector<16x32xf32> to vector<16x8xf32>
    %291 = vector.shape_cast %290 : vector<16x8xf32> to vector<2x8x8xf32>
    %292 = vector.extract_strided_slice %237 {offsets = [0, 16], sizes = [16, 8], strides = [1, 1]} : vector<16x32xf32> to vector<16x8xf32>
    %293 = vector.shape_cast %292 : vector<16x8xf32> to vector<2x8x8xf32>
    %294 = vector.extract_strided_slice %238 {offsets = [0, 16], sizes = [16, 8], strides = [1, 1]} : vector<16x32xf32> to vector<16x8xf32>
    %295 = vector.shape_cast %294 : vector<16x8xf32> to vector<2x8x8xf32>
    "tpu.trace_start"() <{level = 10 : i32, message = "bqd,bkd->bqk"}> : () -> ()
    %cst_111 = arith.constant dense<0.000000e+00> : vector<2x8x8xf32>
    %296 = tpu.matmul %291, %293, %cst_111 {dimension_numbers = #tpu.dot_dimension_numbers<[2], [2], [1], [1], [0, 0, 0, 1, 1, 1], [0], [0]>} : vector<2x8x8xf32>, vector<2x8x8xf32>, vector<2x8x8xf32> -> vector<2x8x8xf32>
    "tpu.trace_stop"() : () -> ()
    %297 = vector.broadcast %30 : vector<2x1x8xf32> to vector<2x8x8xf32>
    %298 = arith.addf %296, %297 : vector<2x8x8xf32>
    %cst_112 = arith.constant dense<0xFF800000> : vector<2x8xf32>
    %299 = vector.multi_reduction <maximumf>, %298, %cst_112 [2] : vector<2x8x8xf32> to vector<2x8xf32>
    %300 = vector.shape_cast %299 : vector<2x8xf32> to vector<2x8x1xf32>
    %301 = vector.broadcast %300 : vector<2x8x1xf32> to vector<2x8x8xf32>
    %302 = arith.subf %298, %301 : vector<2x8x8xf32>
    %303 = math.exp %302 : vector<2x8x8xf32>
    %cst_113 = arith.constant dense<0.000000e+00> : vector<2x8xf32>
    %304 = vector.multi_reduction <add>, %303, %cst_113 [2] : vector<2x8x8xf32> to vector<2x8xf32>
    %305 = vector.shape_cast %304 : vector<2x8xf32> to vector<2x8x1xf32>
    %306 = tpu.reciprocal %305 {approx = true} : vector<2x8x1xf32> -> vector<2x8x1xf32>
    %307 = vector.broadcast %306 : vector<2x8x1xf32> to vector<2x8x8xf32>
    %308 = arith.mulf %303, %307 : vector<2x8x8xf32>
    "tpu.trace_start"() <{level = 10 : i32, message = "bqk,bkd->bqd"}> : () -> ()
    %cst_114 = arith.constant dense<0.000000e+00> : vector<2x8x8xf32>
    %309 = tpu.matmul %308, %295, %cst_114 {dimension_numbers = #tpu.dot_dimension_numbers<[2], [1], [1], [2], [0, 0, 0, 1, 1, 2], [0], [0]>} : vector<2x8x8xf32>, vector<2x8x8xf32>, vector<2x8x8xf32> -> vector<2x8x8xf32>
    "tpu.trace_stop"() : () -> ()
    %310 = vector.shape_cast %309 : vector<2x8x8xf32> to vector<16x8xf32>
    %311 = vector.extract_strided_slice %240 {offsets = [16, 0], sizes = [8, 32], strides = [1, 1]} : vector<32x32xf32> to vector<8x32xf32>
    %cst_115 = arith.constant dense<0.000000e+00> : vector<16x32xf32>
    %312 = tpu.matmul %310, %311, %cst_115 {dimension_numbers = #tpu.dot_dimension_numbers<[1], [0], [0], [1], [0, 0, 1, 1], [], []>} : vector<16x8xf32>, vector<8x32xf32>, vector<16x32xf32> -> vector<16x32xf32>
    %313 = arith.addf %289, %312 : vector<16x32xf32>
    %314 = vector.extract_strided_slice %236 {offsets = [0, 24], sizes = [16, 8], strides = [1, 1]} : vector<16x32xf32> to vector<16x8xf32>
    %315 = vector.shape_cast %314 : vector<16x8xf32> to vector<2x8x8xf32>
    %316 = vector.extract_strided_slice %237 {offsets = [0, 24], sizes = [16, 8], strides = [1, 1]} : vector<16x32xf32> to vector<16x8xf32>
    %317 = vector.shape_cast %316 : vector<16x8xf32> to vector<2x8x8xf32>
    %318 = vector.extract_strided_slice %238 {offsets = [0, 24], sizes = [16, 8], strides = [1, 1]} : vector<16x32xf32> to vector<16x8xf32>
    %319 = vector.shape_cast %318 : vector<16x8xf32> to vector<2x8x8xf32>
    "tpu.trace_start"() <{level = 10 : i32, message = "bqd,bkd->bqk"}> : () -> ()
    %cst_116 = arith.constant dense<0.000000e+00> : vector<2x8x8xf32>
    %320 = tpu.matmul %315, %317, %cst_116 {dimension_numbers = #tpu.dot_dimension_numbers<[2], [2], [1], [1], [0, 0, 0, 1, 1, 1], [0], [0]>} : vector<2x8x8xf32>, vector<2x8x8xf32>, vector<2x8x8xf32> -> vector<2x8x8xf32>
    "tpu.trace_stop"() : () -> ()
    %321 = vector.broadcast %30 : vector<2x1x8xf32> to vector<2x8x8xf32>
    %322 = arith.addf %320, %321 : vector<2x8x8xf32>
    %cst_117 = arith.constant dense<0xFF800000> : vector<2x8xf32>
    %323 = vector.multi_reduction <maximumf>, %322, %cst_117 [2] : vector<2x8x8xf32> to vector<2x8xf32>
    %324 = vector.shape_cast %323 : vector<2x8xf32> to vector<2x8x1xf32>
    %325 = vector.broadcast %324 : vector<2x8x1xf32> to vector<2x8x8xf32>
    %326 = arith.subf %322, %325 : vector<2x8x8xf32>
    %327 = math.exp %326 : vector<2x8x8xf32>
    %cst_118 = arith.constant dense<0.000000e+00> : vector<2x8xf32>
    %328 = vector.multi_reduction <add>, %327, %cst_118 [2] : vector<2x8x8xf32> to vector<2x8xf32>
    %329 = vector.shape_cast %328 : vector<2x8xf32> to vector<2x8x1xf32>
    %330 = tpu.reciprocal %329 {approx = true} : vector<2x8x1xf32> -> vector<2x8x1xf32>
    %331 = vector.broadcast %330 : vector<2x8x1xf32> to vector<2x8x8xf32>
    %332 = arith.mulf %327, %331 : vector<2x8x8xf32>
    "tpu.trace_start"() <{level = 10 : i32, message = "bqk,bkd->bqd"}> : () -> ()
    %cst_119 = arith.constant dense<0.000000e+00> : vector<2x8x8xf32>
    %333 = tpu.matmul %332, %319, %cst_119 {dimension_numbers = #tpu.dot_dimension_numbers<[2], [1], [1], [2], [0, 0, 0, 1, 1, 2], [0], [0]>} : vector<2x8x8xf32>, vector<2x8x8xf32>, vector<2x8x8xf32> -> vector<2x8x8xf32>
    "tpu.trace_stop"() : () -> ()
    %334 = vector.shape_cast %333 : vector<2x8x8xf32> to vector<16x8xf32>
    %335 = vector.extract_strided_slice %240 {offsets = [24, 0], sizes = [8, 32], strides = [1, 1]} : vector<32x32xf32> to vector<8x32xf32>
    %cst_120 = arith.constant dense<0.000000e+00> : vector<16x32xf32>
    %336 = tpu.matmul %334, %335, %cst_120 {dimension_numbers = #tpu.dot_dimension_numbers<[1], [0], [0], [1], [0, 0, 1, 1], [], []>} : vector<16x8xf32>, vector<8x32xf32>, vector<16x32xf32> -> vector<16x32xf32>
    %337 = arith.addf %313, %336 : vector<16x32xf32>
    %c1_121 = arith.constant 1 : index
    %c0_122 = arith.constant 0 : index
    %c0_123 = arith.constant 0 : index
    %338 = vector.load %arg7[%c1_121, %c0_122, %c0_123] : memref<2x1x32xf32, #tpu.memory_space<vmem>>, vector<1x1x32xf32>
    %339 = vector.shape_cast %338 : vector<1x1x32xf32> to vector<1x32xf32>
    %340 = vector.broadcast %339 : vector<1x32xf32> to vector<16x32xf32>
    %341 = arith.addf %337, %340 : vector<16x32xf32>
    %342 = arith.addf %341, %226 : vector<16x32xf32>
    %c1_124 = arith.constant 1 : index
    %c0_125 = arith.constant 0 : index
    %c0_126 = arith.constant 0 : index
    %343 = vector.load %arg8[%c1_124, %c0_125, %c0_126] : memref<2x1x32xf32, #tpu.memory_space<vmem>>, vector<1x1x32xf32>
    %344 = vector.shape_cast %343 : vector<1x1x32xf32> to vector<1x32xf32>
    %c1_127 = arith.constant 1 : index
    %c0_128 = arith.constant 0 : index
    %c0_129 = arith.constant 0 : index
    %345 = vector.load %arg9[%c1_127, %c0_128, %c0_129] : memref<2x1x32xf32, #tpu.memory_space<vmem>>, vector<1x1x32xf32>
    %346 = vector.shape_cast %345 : vector<1x1x32xf32> to vector<1x32xf32>
    %cst_130 = arith.constant dense<0.000000e+00> : vector<16xf32>
    %347 = vector.multi_reduction <add>, %342, %cst_130 [1] : vector<16x32xf32> to vector<16xf32>
    %348 = vector.shape_cast %347 : vector<16xf32> to vector<16x1xf32>
    %cst_131 = arith.constant 3.200000e+01 : f32
    %349 = vector.broadcast %cst_131 : f32 to vector<16x1xf32>
    %350 = arith.divf %348, %349 : vector<16x1xf32>
    %351 = vector.broadcast %350 : vector<16x1xf32> to vector<16x32xf32>
    %352 = arith.subf %342, %351 : vector<16x32xf32>
    %353 = arith.mulf %352, %352 : vector<16x32xf32>
    %cst_132 = arith.constant dense<0.000000e+00> : vector<16xf32>
    %354 = vector.multi_reduction <add>, %353, %cst_132 [1] : vector<16x32xf32> to vector<16xf32>
    %355 = vector.shape_cast %354 : vector<16xf32> to vector<16x1xf32>
    %cst_133 = arith.constant 3.200000e+01 : f32
    %356 = vector.broadcast %cst_133 : f32 to vector<16x1xf32>
    %357 = arith.divf %355, %356 : vector<16x1xf32>
    %cst_134 = arith.constant 9.99999996E-13 : f32
    %358 = vector.broadcast %cst_134 : f32 to vector<16x1xf32>
    %359 = arith.addf %357, %358 : vector<16x1xf32>
    %360 = math.rsqrt %359 : vector<16x1xf32>
    %361 = vector.broadcast %350 : vector<16x1xf32> to vector<16x32xf32>
    %362 = arith.subf %342, %361 : vector<16x32xf32>
    %363 = vector.broadcast %360 : vector<16x1xf32> to vector<16x32xf32>
    %364 = arith.mulf %362, %363 : vector<16x32xf32>
    %365 = vector.broadcast %344 : vector<1x32xf32> to vector<16x32xf32>
    %366 = arith.mulf %364, %365 : vector<16x32xf32>
    %367 = vector.broadcast %346 : vector<1x32xf32> to vector<16x32xf32>
    %368 = arith.addf %366, %367 : vector<16x32xf32>
    %c1_135 = arith.constant 1 : index
    %c0_136 = arith.constant 0 : index
    %c0_137 = arith.constant 0 : index
    %369 = vector.load %arg10[%c1_135, %c0_136, %c0_137] : memref<2x32x128xf32, #tpu.memory_space<vmem>>, vector<1x32x128xf32>
    %370 = vector.shape_cast %369 : vector<1x32x128xf32> to vector<32x128xf32>
    %cst_138 = arith.constant dense<0.000000e+00> : vector<16x128xf32>
    %371 = tpu.matmul %368, %370, %cst_138 {dimension_numbers = #tpu.dot_dimension_numbers<[1], [0], [0], [1], [0, 0, 1, 1], [], []>} : vector<16x32xf32>, vector<32x128xf32>, vector<16x128xf32> -> vector<16x128xf32>
    %c1_139 = arith.constant 1 : index
    %c0_140 = arith.constant 0 : index
    %c0_141 = arith.constant 0 : index
    %372 = vector.load %arg11[%c1_139, %c0_140, %c0_141] : memref<2x1x128xf32, #tpu.memory_space<vmem>>, vector<1x1x128xf32>
    %373 = vector.shape_cast %372 : vector<1x1x128xf32> to vector<1x128xf32>
    %374 = vector.broadcast %373 : vector<1x128xf32> to vector<16x128xf32>
    %375 = arith.addf %371, %374 : vector<16x128xf32>
    %376 = arith.mulf %375, %375 : vector<16x128xf32>
    %377 = arith.mulf %375, %376 : vector<16x128xf32>
    %cst_142 = arith.constant 4.471500e-02 : f32
    %378 = vector.broadcast %cst_142 : f32 to vector<16x128xf32>
    %379 = arith.mulf %378, %377 : vector<16x128xf32>
    %380 = arith.addf %375, %379 : vector<16x128xf32>
    %cst_143 = arith.constant 0.797884583 : f32
    %381 = vector.broadcast %cst_143 : f32 to vector<16x128xf32>
    %382 = arith.mulf %381, %380 : vector<16x128xf32>
    %383 = math.tanh %382 : vector<16x128xf32>
    %cst_144 = arith.constant 1.000000e+00 : f32
    %384 = vector.broadcast %cst_144 : f32 to vector<16x128xf32>
    %385 = arith.addf %384, %383 : vector<16x128xf32>
    %cst_145 = arith.constant 5.000000e-01 : f32
    %386 = vector.broadcast %cst_145 : f32 to vector<16x128xf32>
    %387 = arith.mulf %386, %385 : vector<16x128xf32>
    %388 = arith.mulf %375, %387 : vector<16x128xf32>
    %c1_146 = arith.constant 1 : index
    %c0_147 = arith.constant 0 : index
    %c0_148 = arith.constant 0 : index
    %389 = vector.load %arg12[%c1_146, %c0_147, %c0_148] : memref<2x128x32xf32, #tpu.memory_space<vmem>>, vector<1x128x32xf32>
    %390 = vector.shape_cast %389 : vector<1x128x32xf32> to vector<128x32xf32>
    %cst_149 = arith.constant dense<0.000000e+00> : vector<16x32xf32>
    %391 = tpu.matmul %388, %390, %cst_149 {dimension_numbers = #tpu.dot_dimension_numbers<[1], [0], [0], [1], [0, 0, 1, 1], [], []>} : vector<16x128xf32>, vector<128x32xf32>, vector<16x32xf32> -> vector<16x32xf32>
    %c1_150 = arith.constant 1 : index
    %c0_151 = arith.constant 0 : index
    %c0_152 = arith.constant 0 : index
    %392 = vector.load %arg13[%c1_150, %c0_151, %c0_152] : memref<2x1x32xf32, #tpu.memory_space<vmem>>, vector<1x1x32xf32>
    %393 = vector.shape_cast %392 : vector<1x1x32xf32> to vector<1x32xf32>
    %394 = vector.broadcast %393 : vector<1x32xf32> to vector<16x32xf32>
    %395 = arith.addf %391, %394 : vector<16x32xf32>
    %396 = arith.addf %395, %368 : vector<16x32xf32>
    %c1_153 = arith.constant 1 : index
    %c0_154 = arith.constant 0 : index
    %c0_155 = arith.constant 0 : index
    %397 = vector.load %arg14[%c1_153, %c0_154, %c0_155] : memref<2x1x32xf32, #tpu.memory_space<vmem>>, vector<1x1x32xf32>
    %398 = vector.shape_cast %397 : vector<1x1x32xf32> to vector<1x32xf32>
    %c1_156 = arith.constant 1 : index
    %c0_157 = arith.constant 0 : index
    %c0_158 = arith.constant 0 : index
    %399 = vector.load %arg15[%c1_156, %c0_157, %c0_158] : memref<2x1x32xf32, #tpu.memory_space<vmem>>, vector<1x1x32xf32>
    %400 = vector.shape_cast %399 : vector<1x1x32xf32> to vector<1x32xf32>
    %cst_159 = arith.constant dense<0.000000e+00> : vector<16xf32>
    %401 = vector.multi_reduction <add>, %396, %cst_159 [1] : vector<16x32xf32> to vector<16xf32>
    %402 = vector.shape_cast %401 : vector<16xf32> to vector<16x1xf32>
    %cst_160 = arith.constant 3.200000e+01 : f32
    %403 = vector.broadcast %cst_160 : f32 to vector<16x1xf32>
    %404 = arith.divf %402, %403 : vector<16x1xf32>
    %405 = vector.broadcast %404 : vector<16x1xf32> to vector<16x32xf32>
    %406 = arith.subf %396, %405 : vector<16x32xf32>
    %407 = arith.mulf %406, %406 : vector<16x32xf32>
    %cst_161 = arith.constant dense<0.000000e+00> : vector<16xf32>
    %408 = vector.multi_reduction <add>, %407, %cst_161 [1] : vector<16x32xf32> to vector<16xf32>
    %409 = vector.shape_cast %408 : vector<16xf32> to vector<16x1xf32>
    %cst_162 = arith.constant 3.200000e+01 : f32
    %410 = vector.broadcast %cst_162 : f32 to vector<16x1xf32>
    %411 = arith.divf %409, %410 : vector<16x1xf32>
    %cst_163 = arith.constant 9.99999996E-13 : f32
    %412 = vector.broadcast %cst_163 : f32 to vector<16x1xf32>
    %413 = arith.addf %411, %412 : vector<16x1xf32>
    %414 = math.rsqrt %413 : vector<16x1xf32>
    %415 = vector.broadcast %404 : vector<16x1xf32> to vector<16x32xf32>
    %416 = arith.subf %396, %415 : vector<16x32xf32>
    %417 = vector.broadcast %414 : vector<16x1xf32> to vector<16x32xf32>
    %418 = arith.mulf %416, %417 : vector<16x32xf32>
    %419 = vector.broadcast %398 : vector<1x32xf32> to vector<16x32xf32>
    %420 = arith.mulf %418, %419 : vector<16x32xf32>
    %421 = vector.broadcast %400 : vector<1x32xf32> to vector<16x32xf32>
    %422 = arith.addf %420, %421 : vector<16x32xf32>
    %423 = vector.extract_strided_slice %422 {offsets = [0, 0], sizes = [1, 32], strides = [1, 1]} : vector<16x32xf32> to vector<1x32xf32>
    %424 = vector.extract_strided_slice %422 {offsets = [8, 0], sizes = [1, 32], strides = [1, 1]} : vector<16x32xf32> to vector<1x32xf32>
    %425 = tpu.concatenate %423, %424 in 0 : vector<1x32xf32>, vector<1x32xf32> -> vector<2x32xf32>
    %c0_164 = arith.constant 0 : index
    %c0_165 = arith.constant 0 : index
    %426 = vector.load %arg16[%c0_164, %c0_165] : memref<32x1xf32, #tpu.memory_space<vmem>>, vector<32x1xf32>
    %cst_166 = arith.constant dense<0.000000e+00> : vector<2x1xf32>
    %427 = tpu.matmul %425, %426, %cst_166 {dimension_numbers = #tpu.dot_dimension_numbers<[1], [0], [0], [1], [0, 0, 1, 1], [], []>} : vector<2x32xf32>, vector<32x1xf32>, vector<2x1xf32> -> vector<2x1xf32>
    %c0_167 = arith.constant 0 : index
    %c0_168 = arith.constant 0 : index
    %428 = vector.load %arg17[%c0_167, %c0_168] : memref<1x1xf32, #tpu.memory_space<vmem>>, vector<1x1xf32>
    %429 = vector.broadcast %428 : vector<1x1xf32> to vector<2x1xf32>
    %430 = arith.addf %427, %429 : vector<2x1xf32>
    %c0_169 = arith.constant 0 : index
    %c0_170 = arith.constant 0 : index
    %431 = vector.load %arg18[%c0_169, %c0_170] : memref<2x1xf32, #tpu.memory_space<vmem>>, vector<2x1xf32>
    tpu.vector_store %arg18[%c0_169, %c0_170], %430 {strides = array<i32>} : memref<2x1xf32, #tpu.memory_space<vmem>>, vector<2x1xf32>,
    return
  }
}

</mosaic_0001>

<bundles_post_ra>
// kernel: forward.1
= control target key start
LH: loop header
LB: loop body
LE: loop exit
PB: predicated region body
PF: predicated region fallthrough
CT: control target
= control target key end

     0   :  { %vm65_vm0 = vcmask 261120   ;;  %v2245_v4 = vmov 32.0   ;;  %s2247_s20 = smov 96   ;;  %s2248_s21 = smov 120   ;;  %vm185_vm8 = vcmask 64512   ;;  %s2926_s0 = inlined_call_operand.vmem [shape: f32[16,32], index: 0, kind: input, shape index: {}]   ;;  %s2927_s2 = inlined_call_operand.vmem [shape: f32[1,32], index: 2, kind: input, shape index: {}]   ;;  %s2928_s3 = inlined_call_operand.vmem [shape: f32[1,32], index: 3, kind: input, shape index: {}]   ;;  %s2929_s5 = inlined_call_operand.vmem [shape: f32[2,1,96], index: 5, kind: input, shape index: {}]   ;;  %s2930_s4 = inlined_call_operand.vmem [shape: f32[2,32,96], index: 4, kind: input, shape index: {}]   ;;  %s2931_s1 = inlined_call_operand.vmem [shape: f32[2,1,8], index: 1, kind: input, shape index: {}]   ;;  %s2932_s6 = inlined_call_operand.vmem [shape: f32[2,32,32], index: 6, kind: input, shape index: {}]   ;;  %s2933_s7 = inlined_call_operand.vmem [shape: f32[2,1,32], index: 7, kind: input, shape index: {}]   ;;  %s2934_s8 = inlined_call_operand.vmem [shape: f32[2,1,32], index: 8, kind: input, shape index: {}]   ;;  %s2935_s9 = inlined_call_operand.vmem [shape: f32[2,1,32], index: 9, kind: input, shape index: {}]   ;;  %s2936_s11 = inlined_call_operand.vmem [shape: f32[2,1,128], index: 11, kind: input, shape index: {}]   ;;  %s2937_s10 = inlined_call_operand.vmem [shape: f32[2,32,128], index: 10, kind: input, shape index: {}]   ;;  %s2938_s12 = inlined_call_operand.vmem [shape: f32[2,128,32], index: 12, kind: input, shape index: {}]   ;;  %s2939_s13 = inlined_call_operand.vmem [shape: f32[2,1,32], index: 13, kind: input, shape index: {}]   ;;  %s2940_s14 = inlined_call_operand.vmem [shape: f32[2,1,32], index: 14, kind: input, shape index: {}]   ;;  %s2941_s15 = inlined_call_operand.vmem [shape: f32[2,1,32], index: 15, kind: input, shape index: {}]   ;;  %s2942_s16 = inlined_call_operand.vmem [shape: f32[32,1], index: 16, kind: input, shape index: {}]   ;;  %s2943_s17 = inlined_call_operand.<no memory space> [shape: f32[1,1], index: 17, kind: input, shape index: {}]   ;;  %s2944_s18 = inlined_call_operand.vmem [shape: f32[2,1], index: 18, kind: output, shape index: {}]  }
   0x1   :  { %2956 = sst [smem:[#allocation3_spill]] %s2926_s0  ;;  %2151 = vrcp.f32 %v2245_v4  ;;  %v136_v21 = vld [vmem:[%s2930_s4 + $0x18] sm:$0xff]  ;;  %v135_v22 = vld [vmem:[%s2930_s4 + $0x10] sm:$0xff]  ;;  %v134_v23 = vld [vmem:[%s2930_s4 + $0x8] sm:$0xff]  ;;  %s2954_s25 = smov 80  }
   0x2   :  { %2957 = sst [smem:[#allocation4_spill]] %s2927_s2  ;;  %159 = vmatpush.msra.mxu0 %v136_v21  ;;  %v133_v24 = vld [vmem:[%s2930_s4] sm:$0xff]  ;;  %s2246_s2 = smov 88  }
   0x3   :  { %2958 = sst [smem:[#allocation5_spill]] %s2928_s3  ;;  %v2134_v53 = vld [vmem:[%s2929_s5] ss:$0 sm:$0xff]  ;;  %s2252_s26 = smov 56  }
   0x4   :  { %s2959_s29 = sld [smem:[#allocation3_spill]]  ;;  %160 = vmatpush.msra.mxu0 %v135_v22  ;;  %s2950_s19 = smov 48  }
   0x5   :  { %s2960_s27 = sld [smem:[#allocation4_spill]]  ;;  %s2952_s22 = smov 72  }
   0x6   :  { %161 = vmatpush.msra.mxu0 %v134_v23  ;;  %s2961_s30 = sld [smem:[#allocation5_spill]]  ;;  %s2948_s3 = smov 104  }
   0x7   :  { %v2152_v5 = vpop.eup %2151  ;;  %s2946_s28 = smov 40   ;;  %s2964_s0 = smov 48  }
   0x8   :  { %v73_v6 = vmul.f32 32.0, %v2152_v5  ;;  %vm77_vm1 = vweird.f32 %v2152_v5  ;;  %162 = vmatpush.msra.mxu0 %v133_v24  ;;  %s2965_s23 = smov 104  }
   0xa   :  { %v61_v0 = vld [vmem:[%s2959_s29] sm:$0xff]  ;;  %v62_v2 = vld [vmem:[%s2959_s29 + $0x8] sm:$0xff]  ;;  %v74_v7 = vsub.f32 1.0, %v73_v6 }
   0xb   :  { %v66_v1 = vsel %vm65_vm0, %v61_v0, 0.0  ;;  %v69_v3 = vsel %vm65_vm0, %v62_v2, 0.0  ;;  %v2132_v39 = vld [vmem:[%s2960_s27] ss:$0 sm:$0xff]  ;;  %s2253_s27 = smov 112  }
   0xc   :  { %67 = vadd.xlane.f32.xlu0 %v66_v1  ;;  %v75_v8 = vmul.f32 %v2152_v5, %v74_v7  ;;  %v2133_v43 = vld [vmem:[%s2961_s30] ss:$0 sm:$0xff]  ;;  %v2249_v1 = vmov -1e+30  }
   0xe   :  { %v76_v9 = vadd.f32 %v2152_v5, %v75_v8 }
  0x10   :  { %v2361_v10 = vsel %vm77_vm1, %v2152_v5, %v76_v9 }
  0x14   :  { %70 = vadd.xlane.f32.xlu0 %v69_v3  ;;  %v128_v3 = vld [vmem:[%s2931_s1 + $0x1] sm:$0x1] }
  0x15   :  { %vm130_vm10 = vcmp.gt.f32.partialorder %v128_v3, 0.5 }
  0x16   :  { %v132_v7 = vsel %vm130_vm10, 0.0, %v2249_v1 }
  0x17   :  { %v2434_v9 = vperm.slane %v132_v7, 0 }
  0x7f   :  { %v68_v11 = vpop.xlane.xlu0 %67 }
  0x80   :  { %v79_v12 = vmul.f32 %v2361_v10, %v68_v11 }
  0x82   :  { %v81_v13 = vsub.f32 %v61_v0, %v79_v12  ;;  %v127_v0 = vld [vmem:[%s2931_s1] sm:$0x1]  ;;  %s2250_s1 = smov 64  }
  0x83   :  { %vm129_vm9 = vcmp.gt.f32.partialorder %v127_v0, 0.5 }
  0x84   :  { %v83_v14 = vmul.f32 %v81_v13, %v81_v13 }
  0x86   :  { %v85_v15 = vsel %vm65_vm0, %v83_v14, 0.0 }
  0x87   :  { %86 = vadd.xlane.f32.xlu1 %v85_v15  ;;  %v71_v16 = vpop.xlane.xlu0 %70 }
  0x88   :  { %v80_v17 = vmul.f32 %v2361_v10, %v71_v16 }
  0x8a   :  { %v82_v18 = vsub.f32 %v62_v2, %v80_v17  ;;  %v131_v2 = vsel %vm129_vm9, 0.0, %v2249_v1 }
  0x8b   :  { %v2430_v4 = vperm.slane %v131_v2, 0 }
  0x8c   :  { %v84_v19 = vmul.f32 %v82_v18, %v82_v18 }
  0x8e   :  { %v88_v20 = vsel %vm65_vm0, %v84_v19, 0.0 }
  0x8f   :  { %89 = vadd.xlane.f32.xlu1 %v88_v20 }
  0xfa   :  { %v87_v25 = vpop.xlane.xlu1 %86 }
  0xfb   :  { %v91_v26 = vmul.f32 %v87_v25, %v2361_v10 }
  0xfd   :  { %v93_v27 = vadd.f32 1e-12, %v91_v26 }
  0xff   :  { %2153 = vrsqrt.f32 %v93_v27  ;;  %vm101_vm3 = vweird.f32 %v93_v27 }
 0x102   :  { %v90_v28 = vpop.xlane.xlu1 %89 }
 0x103   :  { %v92_v29 = vmul.f32 %v90_v28, %v2361_v10 }
 0x105   :  { %v2154_v30 = vpop.eup %2153  ;;  %v94_v31 = vadd.f32 1e-12, %v92_v29 }
 0x106   :  { %v96_v32 = vmul.f32 %v2154_v30, %v93_v27  ;;  %vm102_vm2 = vweird.f32 %v2154_v30 }
 0x107   :  { %2155 = vrsqrt.f32 %v94_v31  ;;  %vm103_vm4 = vmor %vm101_vm3, %vm102_vm2  ;;  %vm111_vm5 = vweird.f32 %v94_v31 }
 0x108   :  { %v97_v33 = vmul.f32 %v2154_v30, %v96_v32 }
 0x10a   :  { %v98_v34 = vmul.f32 0.5, %v97_v33 }
 0x10c   :  { %v99_v35 = vsub.f32 1.5, %v98_v34 }
 0x10d   :  { %v2156_v36 = vpop.eup %2155 }
 0x10e   :  { %v100_v37 = vmul.f32 %v2154_v30, %v99_v35  ;;  %v106_v38 = vmul.f32 %v2156_v36, %v94_v31  ;;  %vm112_vm6 = vweird.f32 %v2156_v36 }
 0x10f   :  { %vm113_vm7 = vmor %vm111_vm5, %vm112_vm6 }
 0x110   :  { %v104_v40 = vsel %vm103_vm4, %v2154_v30, %v100_v37  ;;  %v107_v41 = vmul.f32 %v2156_v36, %v106_v38 }
 0x111   :  { %v115_v42 = vmul.f32 %v104_v40, %v81_v13 }
 0x112   :  { %v108_v44 = vmul.f32 0.5, %v107_v41 }
 0x113   :  { %v120_v45 = vmul.f32 %v2132_v39, %v115_v42 }
 0x114   :  { %v109_v46 = vsub.f32 1.5, %v108_v44 }
 0x115   :  { %v2387_v47 = vadd.f32 %v2133_v43, %v120_v45 }
 0x116   :  { %v110_v48 = vmul.f32 %v2156_v36, %v109_v46 }
 0x117   :  { %2000 = vmatmul.msk.f32.vlgmr.msra.gmra.mxu0 %vm65_vm0, %v2387_v47 }
 0x118   :  { %v114_v49 = vsel %vm113_vm7, %v2156_v36, %v110_v48 }
 0x119   :  { %v116_v50 = vmul.f32 %v114_v49, %v82_v18 }
 0x11b   :  { %v121_v51 = vmul.f32 %v2132_v39, %v116_v50 }
 0x11d   :  { %v2391_v52 = vadd.f32 %v2133_v43, %v121_v51  ;;  %v172_v51 = vld [vmem:[%s2932_s6] sm:$0xff] }
 0x11f   :  { %2001 = vmatmul.msk.f32.gmra.mxu0 %vm65_vm0, %v2391_v52 }
 0x194   :  { %v164_v54 = vpop.f32.mrf.mxu0 }
 0x195   :  { %v2398_v55 = vadd.f32 %v2134_v53, %v164_v54 }
 0x197   :  { %315 = vrot.lane.b32.xlu0 %v2398_v55, %s2246_s2  ;;  %183 = vrot.lane.b32.xlu2 %v2398_v55, %s2247_s20  ;;  %v2405_v56 = vmul.f32 0.35355338, %v2398_v55 }
 0x199   :  { %313 = vrot.lane.b32.xlu1 %v2405_v56, %s2248_s21 }
 0x19c   :  { %v167_v57 = vpop.f32.mrf.mxu0 }
 0x19d   :  { %v2409_v58 = vadd.f32 %v2134_v53, %v167_v57  ;;  %v173_v57 = vld [vmem:[%s2932_s6 + $0x8] sm:$0xff] }
 0x19e   :  { %464 = vmatpush.msra.mxu2 %v173_v57 }
 0x19f   :  { %212 = vrot.lane.b32.xlu2 %v2409_v58, %s2247_s20  ;;  %v2418_v61 = vmul.f32 0.35355338, %v2409_v58  ;;  %v2122_v16 = vpack.i.bf16 %v2409_v58, %v2398_v55 }
 0x1f1   :  { %v184_v59 = vpop.permute.xlu2 %183 }
 0x1f2   :  { %2002 = vmatpush.xpose.msk.msra.mxu1 %vm185_vm8, %v184_v59 }
 0x1f5   :  { %2003 = vmatmul.msk.f32.vlgmr.msra.gmra.mxu1 %vm185_vm8, %v2405_v56 }
 0x1f9   :  { %v213_v60 = vpop.permute.xlu2 %212 }
 0x1fa   :  { %2004 = vmatpush.xpose.msk.msrb.mxu0 %vm185_vm8, %v213_v60 }
 0x1fd   :  { %2005 = vmatmul.msk.f32.vlgmr.msrb.gmra.mxu0 %vm185_vm8, %v2418_v61 }
 0x1fe   :  { %493 = vmatpush.msra.mxu0 %v172_v51 }
 0x209   :  { %v316_v62 = vpop.permute.xlu0 %315 }
 0x20a   :  { %2008 = vmatpush.xpose.msk.msrb.mxu1 %vm185_vm8, %v316_v62 }
 0x20b   :  { %v314_v63 = vpop.permute.xlu1 %313 }
 0x20d   :  { %2009 = vmatmul.msk.f32.vlgmr.msrb.gmra.mxu1 %vm185_vm8, %v314_v63 }
 0x272   :  { %v208_v5 = vpop.f32.mrf.mxu1 }
 0x273   :  { %v209_v6 = vadd.f32 %v208_v5, %v2430_v4 }
 0x275   :  { %v239_v8 = vsel %vm185_vm8, %v209_v6, -inf }
 0x276   :  { %240 = vmax.xlane.f32.xlu2 %v239_v8 }
 0x27a   :  { %v236_v11 = vpop.f32.mrf.mxu0 }
 0x27b   :  { %v237_v12 = vadd.f32 %v236_v11, %v2434_v9 }
 0x27d   :  { %v242_v13 = vsel %vm185_vm8, %v237_v12, -inf }
 0x27e   :  { %243 = vmax.xlane.f32.xlu0 %v242_v13 }
 0x28a   :  { %v338_v14 = vpop.f32.mrf.mxu1 }
 0x28b   :  { %v339_v15 = vadd.f32 %v338_v14, %v2430_v4 }
 0x28d   :  { %v369_v17 = vsel %vm185_vm8, %v339_v15, -inf }
 0x28e   :  { %2123 = vrot.lane.b32.xlu2 %v2122_v16, %s2250_s1  ;;  %370 = vmax.xlane.f32.xlu1 %v369_v17 }
 0x292   :  { %343 = vrot.lane.b32.xlu0 %v2409_v58, %s2246_s2 }
 0x29a   :  { %503 = vrot.lane.b32.xlu0 %v2398_v55, %s2954_s25 }
 0x2e9   :  { %v241_v18 = vpop.xlane.xlu2 %240 }
 0x2ea   :  { %v245_v19 = vsub.f32 %v209_v6, %v241_v18 }
 0x2ec   :  { %v247_v20 = vmul.f32 1.442695, %v245_v19 }
 0x2ee   :  { %2157 = vpow2.f32 %v247_v20 }
 0x2f1   :  { %v2124_v21 = vpop.permute.xlu2 %2123  ;;  %v244_v22 = vpop.xlane.xlu0 %243 }
 0x2f2   :  { %v246_v23 = vsub.f32 %v237_v12, %v244_v22  ;;  %v2125_v24 = vunpack.i.l.bf16 %v2124_v21  ;;  %v2126_v25 = vunpack.i.h.bf16 %v2124_v21 }
 0x2f4   :  { %v2158_v26 = vpop.eup %2157  ;;  %v249_v27 = vmul.f32 1.442695, %v246_v23  ;;  %282 = vmatpush.msra.mxu3 %v2125_v24 }
 0x2f5   :  { %v251_v28 = vsel %vm185_vm8, %v2158_v26, 0.0 }
 0x2f6   :  { %308 = vmatpush.msrb.mxu3 %v2126_v25  ;;  %2159 = vpow2.f32 %v249_v27  ;;  %252 = vadd.xlane.f32.xlu2 %v251_v28 }
 0x2fc   :  { %v2160_v29 = vpop.eup %2159 }
 0x2fd   :  { %v254_v30 = vsel %vm185_vm8, %v2160_v29, 0.0 }
 0x2fe   :  { %255 = vadd.xlane.f32.xlu2 %v254_v30 }
 0x301   :  { %v371_v31 = vpop.xlane.xlu1 %370 }
 0x302   :  { %v375_v32 = vsub.f32 %v339_v15, %v371_v31 }
 0x304   :  { %v377_v33 = vmul.f32 1.442695, %v375_v32  ;;  %v344_v40 = vpop.permute.xlu0 %343 }
 0x306   :  { %2161 = vpow2.f32 %v377_v33  ;;  %v174_v33 = vld [vmem:[%s2932_s6 + $0x10] sm:$0xff] }
 0x307   :  { %652 = vmatpush.msrb.mxu2 %v174_v33 }
 0x30c   :  { %v2162_v34 = vpop.eup %2161  ;;  %v504_v46 = vpop.permute.xlu0 %503 }
 0x30d   :  { %v381_v35 = vsel %vm185_vm8, %v2162_v34, 0.0 }
 0x30e   :  { %382 = vadd.xlane.f32.xlu1 %v381_v35 }
 0x316   :  { %391 = vrot.lane.b32.xlu2 %v2398_v55, %s2252_s26 }
 0x31e   :  { %501 = vrot.lane.b32.xlu2 %v2405_v56, %s2253_s27 }
 0x327   :  { %341 = vrot.lane.b32.xlu1 %v2418_v61, %s2248_s21 }
 0x32f   :  { %531 = vrot.lane.b32.xlu1 %v2409_v58, %s2954_s25 }
 0x369   :  { %v253_v36 = vpop.xlane.xlu2 %252 }
 0x36a   :  { %2163 = vrcp.f32 %v253_v36 }
 0x370   :  { %v2164_v37 = vpop.eup %2163 }
 0x371   :  { %v256_v38 = vpop.xlane.xlu2 %255  ;;  %v259_v39 = vmul.f32 %v2164_v37, %v2158_v26 }
 0x372   :  { %2165 = vrcp.f32 %v256_v38 }
 0x373   :  { %2006 = vmatmul.msk.f32.vlgmr.msra.gmra.mxu3 %vm185_vm8, %v259_v39 }
 0x374   :  { %2010 = vmatpush.xpose.msk.msra.mxu3 %vm185_vm8, %v344_v40 }
 0x378   :  { %v2166_v41 = vpop.eup %2165 }
 0x379   :  { %v392_v42 = vpop.permute.xlu2 %391  ;;  %v260_v43 = vmul.f32 %v2166_v41, %v2160_v29 }
 0x37b   :  { %2007 = vmatmul.msk.f32.vlgmr.msrb.gmra.mxu3 %vm185_vm8, %v260_v43 }
 0x37c   :  { %412 = vmatpush.msrb.mxu3 %v392_v42 }
 0x381   :  { %v383_v44 = vpop.xlane.xlu1 %382  ;;  %v502_v50 = vpop.permute.xlu2 %501 }
 0x382   :  { %2167 = vrcp.f32 %v383_v44 }
 0x388   :  { %v2168_v48 = vpop.eup %2167 }
 0x389   :  { %v389_v49 = vmul.f32 %v2168_v48, %v2162_v34 }
 0x399   :  { %v342_v45 = vpop.permute.xlu1 %341 }
 0x39a   :  { %2011 = vmatmul.msk.f32.vlgmr.msra.gmra.mxu3 %vm185_vm8, %v342_v45 }
 0x39b   :  { %2018 = vmatpush.xpose.msk.msra.mxu3 %vm185_vm8, %v504_v46 }
 0x3a1   :  { %v532_v15 = vpop.permute.xlu1 %531 }
 0x3a2   :  { %2012 = vmatmul.msk.f32.vlgmr.msrb.gmra.mxu3 %vm185_vm8, %v389_v49 }
 0x3aa   :  { %2019 = vmatmul.msk.f32.vlgmr.msra.gmra.mxu3 %vm185_vm8, %v502_v50 }
 0x3f6   :  { %v284_v53 = vpop.f32.mrf.mxu3 }
 0x3f7   :  { %2016 = vmatmul.msk.f32.vlgmr.msra.gmra.mxu0 %vm185_vm8, %v284_v53 }
 0x3fe   :  { %v310_v54 = vpop.f32.mrf.mxu3 }
 0x3ff   :  { %2017 = vmatmul.msk.f32.gmra.mxu0 %vm185_vm8, %v310_v54 }
 0x41d   :  { %v366_v59 = vpop.f32.mrf.mxu3 }
 0x41e   :  { %v367_v60 = vadd.f32 %v366_v59, %v2434_v9 }
 0x420   :  { %v372_v62 = vsel %vm185_vm8, %v367_v60, -inf }
 0x421   :  { %373 = vmax.xlane.f32.xlu0 %v372_v62 }
 0x425   :  { %v414_v63 = vpop.f32.mrf.mxu3 }
 0x426   :  { %2014 = vmatmul.msk.f32.vlgmr.msra.gmra.mxu2 %vm185_vm8, %v414_v63 }
 0x42d   :  { %v526_v0 = vpop.f32.mrf.mxu3 }
 0x42e   :  { %v527_v1 = vadd.f32 %v526_v0, %v2430_v4 }
 0x430   :  { %v557_v2 = vsel %vm185_vm8, %v527_v1, -inf }
 0x431   :  { %558 = vmax.xlane.f32.xlu2 %v557_v2 }
 0x435   :  { %417 = vrot.lane.b32.xlu0 %v2409_v58, %s2252_s26 }
 0x43d   :  { %579 = vrot.lane.b32.xlu0 %v2398_v55, %s2950_s19 }
 0x445   :  { %664 = vrot.lane.b32.xlu0 %v2398_v55, %s2952_s22 }
 0x449   :  { %529 = vrot.lane.b32.xlu2 %v2418_v61, %s2253_s27 }
 0x44d   :  { %662 = vrot.lane.b32.xlu0 %v2405_v56, %s2948_s3 }
 0x474   :  { %v2499_v26 = vpop.f32.mrf.mxu0 }
 0x494   :  { %v374_v3 = vpop.xlane.xlu0 %373 }
 0x495   :  { %v376_v5 = vsub.f32 %v367_v60, %v374_v3 }
 0x497   :  { %v379_v6 = vmul.f32 1.442695, %v376_v5 }
 0x499   :  { %2169 = vpow2.f32 %v379_v6 }
 0x49f   :  { %v2170_v7 = vpop.eup %2169 }
 0x4a0   :  { %v384_v8 = vsel %vm185_vm8, %v2170_v7, 0.0 }
 0x4a1   :  { %385 = vadd.xlane.f32.xlu1 %v384_v8 }
 0x4a4   :  { %v559_v11 = vpop.xlane.xlu2 %558 }
 0x4a5   :  { %v563_v12 = vsub.f32 %v527_v1, %v559_v11 }
 0x4a7   :  { %v565_v13 = vmul.f32 1.442695, %v563_v12  ;;  %v418_v14 = vpop.permute.xlu0 %417 }
 0x4a8   :  { %438 = vmatpush.msra.mxu1 %v418_v14 }
 0x4a9   :  { %2171 = vpow2.f32 %v565_v13 }
 0x4aa   :  { %2020 = vmatpush.xpose.msk.msrb.mxu1 %vm185_vm8, %v532_v15 }
 0x4ac   :  { %v530_v22 = vpop.permute.xlu2 %529 }
 0x4af   :  { %v2172_v16 = vpop.eup %2171  ;;  %v580_v17 = vpop.permute.xlu0 %579 }
 0x4b0   :  { %600 = vmatpush.msrb.mxu3 %v580_v17  ;;  %v569_v56 = vsel %vm185_vm8, %v2172_v16, 0.0 }
 0x4b1   :  { %570 = vadd.xlane.f32.xlu2 %v569_v56 }
 0x4b7   :  { %v665_v18 = vpop.permute.xlu0 %664 }
 0x4b8   :  { %2026 = vmatpush.xpose.msk.msrb.mxu0 %vm185_vm8, %v665_v18 }
 0x4ba   :  { %692 = vrot.lane.b32.xlu1 %v2409_v58, %s2952_s22 }
 0x4bf   :  { %v663_v19 = vpop.permute.xlu0 %662 }
 0x4c0   :  { %2027 = vmatmul.msk.f32.vlgmr.msrb.gmra.mxu0 %vm185_vm8, %v663_v19 }
 0x4c9   :  { %690 = vrot.lane.b32.xlu2 %v2418_v61, %s2948_s3  ;;  %v2503_v61 = vpop.f32.mrf.mxu0 }
 0x514   :  { %v386_v20 = vpop.xlane.xlu1 %385 }
 0x515   :  { %2173 = vrcp.f32 %v386_v20  ;;  %v2135_v20 = vld [vmem:[%s2933_s7] ss:$0 sm:$0xff] }
 0x51b   :  { %v2174_v21 = vpop.eup %2173 }
 0x51c   :  { %v390_v23 = vmul.f32 %v2174_v21, %v2170_v7 }
 0x51e   :  { %2013 = vmatmul.msk.f32.vlgmr.msra.gmra.mxu1 %vm185_vm8, %v390_v23 }
 0x524   :  { %v571_v24 = vpop.xlane.xlu2 %570 }
 0x525   :  { %2175 = vrcp.f32 %v571_v24 }
 0x526   :  { %2021 = vmatmul.msk.f32.vlgmr.msrb.gmra.mxu1 %vm185_vm8, %v530_v22 }
 0x52b   :  { %v2176_v25 = vpop.eup %2175 }
 0x52c   :  { %v577_v27 = vmul.f32 %v2176_v25, %v2172_v16  ;;  %v693_v28 = vpop.permute.xlu1 %692  ;;  %v691_v29 = vpop.permute.xlu2 %690 }
 0x52d   :  { %2028 = vmatpush.xpose.msk.msra.mxu3 %vm185_vm8, %v693_v28  ;;  %v466_v16 = vpop.f32.mrf.mxu2 }
 0x52e   :  { %2022 = vmatmul.msk.f32.vlgmr.msrb.gmra.mxu3 %vm185_vm8, %v577_v27  ;;  %v496_v18 = vadd.f32 %v2499_v26, %v466_v16 }
 0x536   :  { %2029 = vmatmul.msk.f32.vlgmr.msra.gmra.mxu3 %vm185_vm8, %v691_v29 }
 0x53d   :  { %v687_v30 = vpop.f32.mrf.mxu0 }
 0x53e   :  { %v688_v31 = vadd.f32 %v687_v30, %v2430_v4 }
 0x540   :  { %v718_v32 = vsel %vm185_vm8, %v688_v31, -inf }
 0x541   :  { %719 = vmax.xlane.f32.xlu0 %v718_v32 }
 0x59b   :  { %v440_v34 = vpop.f32.mrf.mxu1 }
 0x59c   :  { %2015 = vmatmul.msk.f32.gmra.mxu2 %vm185_vm8, %v440_v34 }
 0x5a3   :  { %v554_v35 = vpop.f32.mrf.mxu1 }
 0x5a4   :  { %v555_v36 = vadd.f32 %v554_v35, %v2434_v9 }
 0x5a6   :  { %v560_v37 = vsel %vm185_vm8, %v555_v36, -inf }
 0x5a7   :  { %561 = vmax.xlane.f32.xlu1 %v560_v37 }
 0x5b1   :  { %v602_v38 = vpop.f32.mrf.mxu3 }
 0x5b2   :  { %2024 = vmatmul.msk.f32.vlgmr.msrb.gmra.mxu2 %vm185_vm8, %v602_v38 }
 0x5b4   :  { %v720_v39 = vpop.xlane.xlu0 %719 }
 0x5b5   :  { %v724_v40 = vsub.f32 %v688_v31, %v720_v39 }
 0x5b7   :  { %v726_v41 = vmul.f32 1.442695, %v724_v40 }
 0x5b9   :  { %2177 = vpow2.f32 %v726_v41  ;;  %v715_v42 = vpop.f32.mrf.mxu3 }
 0x5ba   :  { %v716_v43 = vadd.f32 %v715_v42, %v2434_v9  ;;  %v889_v42 = vld [vmem:[%s2937_s10 + $0x10] sm:$0xff] }
 0x5bc   :  { %v721_v44 = vsel %vm185_vm8, %v716_v43, -inf }
 0x5bd   :  { %722 = vmax.xlane.f32.xlu2 %v721_v44  ;;  %v887_v44 = vld [vmem:[%s2937_s10] sm:$0xff] }
 0x5bf   :  { %v2178_v45 = vpop.eup %2177 }
 0x5c0   :  { %v730_v46 = vsel %vm185_vm8, %v2178_v45, 0.0 }
 0x5c1   :  { %731 = vadd.xlane.f32.xlu0 %v730_v46 }
 0x5d5   :  { %605 = vrot.lane.b32.xlu2 %v2409_v58, %s2950_s19  ;;  %740 = vrot.lane.b32.xlu0 %v2398_v55, %s2946_s28 }
 0x61a   :  { %v562_v48 = vpop.xlane.xlu1 %561 }
 0x61b   :  { %v564_v49 = vsub.f32 %v555_v36, %v562_v48 }
 0x61d   :  { %v567_v50 = vmul.f32 1.442695, %v564_v49 }
 0x61f   :  { %2179 = vpow2.f32 %v567_v50  ;;  %v469_v17 = vpop.f32.mrf.mxu2 }
 0x620   :  { %v499_v28 = vadd.f32 %v2503_v61, %v469_v17 }
 0x625   :  { %v2180_v51 = vpop.eup %2179 }
 0x626   :  { %v572_v53 = vsel %vm185_vm8, %v2180_v51, 0.0 }
 0x627   :  { %573 = vadd.xlane.f32.xlu1 %v572_v53 }
 0x630   :  { %v723_v54 = vpop.xlane.xlu2 %722 }
 0x631   :  { %v725_v57 = vsub.f32 %v716_v43, %v723_v54  ;;  %v888_v43 = vld [vmem:[%s2937_s10 + $0x8] sm:$0xff] }
 0x633   :  { %v728_v59 = vmul.f32 1.442695, %v725_v57 }
 0x634   :  { %v732_v0 = vpop.xlane.xlu0 %731 }
 0x635   :  { %2181 = vpow2.f32 %v728_v59  ;;  %v654_v56 = vpop.f32.mrf.mxu2  ;;  %v2136_v59 = vld [vmem:[%s2934_s8] ss:$0 sm:$0xff] }
 0x636   :  { %v660_v19 = vadd.f32 %v654_v56, %v496_v18  ;;  %v954_v18 = vld [vmem:[%s2938_s12 + $0x60] sm:$0xff] }
 0x638   :  { %v606_v60 = vpop.permute.xlu2 %605 }
 0x639   :  { %626 = vmatpush.msra.mxu1 %v606_v60 }
 0x63b   :  { %v2182_v62 = vpop.eup %2181 }
 0x63c   :  { %v733_v63 = vsel %vm185_vm8, %v2182_v62, 0.0 }
 0x63d   :  { %734 = vadd.xlane.f32.xlu1 %v733_v63  ;;  %v2137_v63 = vld [vmem:[%s2935_s9] ss:$0 sm:$0xff] }
 0x647   :  { %v741_v55 = vpop.permute.xlu0 %740 }
 0x648   :  { %761 = vmatpush.msrb.mxu1 %v741_v55 }
 0x656   :  { %766 = vrot.lane.b32.xlu1 %v2409_v58, %s2946_s28  ;;  %v175_v58 = vld [vmem:[%s2932_s6 + $0x18] sm:$0xff]  ;;  %s2966_s28 = smov 40  }
 0x657   :  { %813 = vmatpush.msrb.mxu3 %v175_v58 }
 0x69a   :  { %v574_v1 = vpop.xlane.xlu1 %573 }
 0x69b   :  { %2183 = vrcp.f32 %v574_v1  ;;  %v957_v1 = vld [vmem:[%s2938_s12 + $0x78] sm:$0xff] }
 0x69c   :  { %2185 = vrcp.f32 %v732_v0  ;;  %962 = vmatpush.msra.mxu2 %v957_v1 }
 0x6a1   :  { %v2184_v2 = vpop.eup %2183 }
 0x6a2   :  { %v578_v3 = vmul.f32 %v2184_v2, %v2180_v51  ;;  %v2186_v5 = vpop.eup %2185  ;;  %v956_v2 = vld [vmem:[%s2938_s12 + $0x70] sm:$0xff] }
 0x6a3   :  { %v738_v6 = vmul.f32 %v2186_v5, %v2178_v45  ;;  %963 = vmatpush.msra.mxu2 %v956_v2 }
 0x6a4   :  { %2023 = vmatmul.msk.f32.vlgmr.msra.gmra.mxu1 %vm185_vm8, %v578_v3  ;;  %v955_v3 = vld [vmem:[%s2938_s12 + $0x68] sm:$0xff] }
 0x6a5   :  { %964 = vmatpush.msra.mxu2 %v955_v3 }
 0x6a7   :  { %965 = vmatpush.msra.mxu2 %v954_v18 }
 0x6ac   :  { %2030 = vmatmul.msk.f32.vlgmr.msrb.gmra.mxu1 %vm185_vm8, %v738_v6 }
 0x6b0   :  { %v735_v7 = vpop.xlane.xlu1 %734 }
 0x6b1   :  { %2187 = vrcp.f32 %v735_v7 }
 0x6b7   :  { %v2188_v8 = vpop.eup %2187 }
 0x6b8   :  { %v739_v11 = vmul.f32 %v2188_v8, %v2182_v62 }
 0x6c8   :  { %v767_v12 = vpop.permute.xlu1 %766 }
 0x6c9   :  { %787 = vmatpush.msra.mxu0 %v767_v12 }
 0x6ca   :  { %2031 = vmatmul.msk.f32.vlgmr.msra.gmra.mxu0 %vm185_vm8, %v739_v11 }
 0x721   :  { %v628_v13 = vpop.f32.mrf.mxu1 }
 0x722   :  { %2025 = vmatmul.msk.f32.gmra.mxu2 %vm185_vm8, %v628_v13 }
 0x729   :  { %v763_v14 = vpop.f32.mrf.mxu1 }
 0x72a   :  { %2032 = vmatmul.msk.f32.vlgmr.msrb.gmra.mxu3 %vm185_vm8, %v763_v14 }
 0x747   :  { %v789_v15 = vpop.f32.mrf.mxu0 }
 0x748   :  { %2033 = vmatmul.msk.f32.gmra.mxu3 %vm185_vm8, %v789_v15 }
 0x7a5   :  { %v657_v27 = vpop.f32.mrf.mxu2 }
 0x7a6   :  { %v661_v29 = vadd.f32 %v657_v27, %v499_v28  ;;  %v946_v27 = vld [vmem:[%s2938_s12 + $0x20] sm:$0xff]  ;;  %v945_v28 = vld [vmem:[%s2938_s12 + $0x18] sm:$0xff] }
 0x7ad   :  { %v815_v21 = vpop.f32.mrf.mxu3 }
 0x7ae   :  { %v821_v22 = vadd.f32 %v815_v21, %v660_v19  ;;  %v953_v19 = vld [vmem:[%s2938_s12 + $0x58] sm:$0xff]  ;;  %v951_v21 = vld [vmem:[%s2938_s12 + $0x48] sm:$0xff] }
 0x7af   :  { %966 = vmatpush.msra.mxu2 %v953_v19 }
 0x7b0   :  { %v827_v23 = vadd.f32 %v2135_v20, %v821_v22  ;;  %v950_v22 = vld [vmem:[%s2938_s12 + $0x40] sm:$0xff] }
 0x7b2   :  { %v829_v24 = vadd.f32 %v827_v23, %v2387_v47  ;;  %v949_v23 = vld [vmem:[%s2938_s12 + $0x38] sm:$0xff] }
 0x7b4   :  { %v833_v25 = vsel %vm65_vm0, %v829_v24, 0.0 }
 0x7b5   :  { %834 = vadd.xlane.f32.xlu2 %v833_v25  ;;  %v947_v25 = vld [vmem:[%s2938_s12 + $0x28] sm:$0xff] }
 0x7cb   :  { %v818_v30 = vpop.f32.mrf.mxu3 }
 0x7cc   :  { %v822_v31 = vadd.f32 %v818_v30, %v661_v29  ;;  %v944_v29 = vld [vmem:[%s2938_s12 + $0x10] sm:$0xff]  ;;  %v943_v30 = vld [vmem:[%s2938_s12 + $0x8] sm:$0xff] }
 0x7ce   :  { %v828_v26 = vadd.f32 %v2135_v20, %v822_v31  ;;  %v952_v20 = vld [vmem:[%s2938_s12 + $0x50] sm:$0xff]  ;;  %v942_v31 = vld [vmem:[%s2938_s12] sm:$0xff] }
 0x7cf   :  { %967 = vmatpush.msra.mxu2 %v952_v20 }
 0x7d0   :  { %v830_v32 = vadd.f32 %v828_v26, %v2391_v52  ;;  %v890_v52 = vld [vmem:[%s2937_s10 + $0x18] sm:$0xff]  ;;  %v2138_v26 = vld [vmem:[%s2936_s11] ss:$0 sm:$0xff] }
 0x7d1   :  { %913 = vmatpush.msra.mxu1 %v890_v52  ;;  %968 = vmatpush.msra.mxu2 %v951_v21 }
 0x7d2   :  { %v836_v33 = vsel %vm65_vm0, %v830_v32, 0.0 }
 0x7d3   :  { %837 = vadd.xlane.f32.xlu0 %v836_v33  ;;  %914 = vmatpush.msra.mxu1 %v889_v42 }
 0x7d4   :  { %969 = vmatpush.msra.mxu2 %v950_v22 }
 0x7d5   :  { %915 = vmatpush.msra.mxu1 %v888_v43 }
 0x7d6   :  { %970 = vmatpush.msra.mxu2 %v949_v23 }
 0x7d7   :  { %916 = vmatpush.msra.mxu1 %v887_v44 }
 0x828   :  { %v835_v34 = vpop.xlane.xlu2 %834 }
 0x829   :  { %v839_v35 = vmul.f32 %v835_v34, %v2361_v10 }
 0x82b   :  { %v841_v36 = vsub.f32 %v829_v24, %v839_v35  ;;  %v948_v24 = vld [vmem:[%s2938_s12 + $0x30] sm:$0xff] }
 0x82c   :  { %971 = vmatpush.msra.mxu2 %v948_v24 }
 0x82d   :  { %v843_v47 = vmul.f32 %v841_v36, %v841_v36 }
 0x82e   :  { %972 = vmatpush.msra.mxu2 %v947_v25  ;;  %v2140_v25 = vld [vmem:[%s2940_s14] ss:$0 sm:$0xff] }
 0x82f   :  { %v845_v37 = vsel %vm65_vm0, %v843_v47, 0.0 }
 0x830   :  { %846 = vadd.xlane.f32.xlu1 %v845_v37  ;;  %973 = vmatpush.msra.mxu2 %v946_v27 }
 0x832   :  { %974 = vmatpush.msra.mxu2 %v945_v28 }
 0x834   :  { %975 = vmatpush.msra.mxu2 %v944_v29  ;;  %v2141_v29 = vld [vmem:[%s2941_s15] ss:$0 sm:$0xff] }
 0x836   :  { %976 = vmatpush.msra.mxu2 %v943_v30 }
 0x838   :  { %977 = vmatpush.msra.mxu2 %v942_v31 }
 0x846   :  { %v838_v38 = vpop.xlane.xlu0 %837 }
 0x847   :  { %v840_v61 = vmul.f32 %v838_v38, %v2361_v10 }
 0x849   :  { %v842_v39 = vsub.f32 %v830_v32, %v840_v61 }
 0x84b   :  { %v844_v40 = vmul.f32 %v842_v39, %v842_v39 }
 0x84d   :  { %v848_v41 = vsel %vm65_vm0, %v844_v40, 0.0 }
 0x84e   :  { %849 = vadd.xlane.f32.xlu2 %v848_v41 }
 0x8a3   :  { %v847_v45 = vpop.xlane.xlu1 %846 }
 0x8a4   :  { %v851_v46 = vmul.f32 %v847_v45, %v2361_v10 }
 0x8a6   :  { %v853_v48 = vadd.f32 1e-12, %v851_v46 }
 0x8a8   :  { %2189 = vrsqrt.f32 %v853_v48  ;;  %vm861_vm12 = vweird.f32 %v853_v48 }
 0x8ae   :  { %v2190_v49 = vpop.eup %2189 }
 0x8af   :  { %v856_v50 = vmul.f32 %v2190_v49, %v853_v48  ;;  %vm862_vm11 = vweird.f32 %v2190_v49 }
 0x8b0   :  { %vm863_vm13 = vmor %vm861_vm12, %vm862_vm11 }
 0x8b1   :  { %v857_v51 = vmul.f32 %v2190_v49, %v856_v50 }
 0x8b3   :  { %v858_v53 = vmul.f32 0.5, %v857_v51 }
 0x8b5   :  { %v859_v54 = vsub.f32 1.5, %v858_v53  ;;  %v2139_v53 = vld [vmem:[%s2939_s13] ss:$0 sm:$0xff] }
 0x8b7   :  { %v860_v57 = vmul.f32 %v2190_v49, %v859_v54 }
 0x8b9   :  { %v864_v60 = vsel %vm863_vm13, %v2190_v49, %v860_v57 }
 0x8ba   :  { %v875_v62 = vmul.f32 %v864_v60, %v841_v36 }
 0x8bc   :  { %v880_v0 = vmul.f32 %v2136_v59, %v875_v62 }
 0x8be   :  { %v2567_v55 = vadd.f32 %v2137_v63, %v880_v0 }
 0x8c0   :  { %2034 = vmatmul.msk.f32.vlgmr.msra.gmra.mxu1 %vm65_vm0, %v2567_v55 }
 0x8c1   :  { %v850_v5 = vpop.xlane.xlu2 %849 }
 0x8c2   :  { %v852_v6 = vmul.f32 %v850_v5, %v2361_v10 }
 0x8c4   :  { %v854_v7 = vadd.f32 1e-12, %v852_v6 }
 0x8c6   :  { %2191 = vrsqrt.f32 %v854_v7  ;;  %vm871_vm15 = vweird.f32 %v854_v7 }
 0x8cc   :  { %v2192_v8 = vpop.eup %2191 }
 0x8cd   :  { %v866_v11 = vmul.f32 %v2192_v8, %v854_v7  ;;  %vm872_vm14 = vweird.f32 %v2192_v8 }
 0x8ce   :  { %vm873_vm1 = vmor %vm871_vm15, %vm872_vm14 }
 0x8cf   :  { %v867_v12 = vmul.f32 %v2192_v8, %v866_v11 }
 0x8d1   :  { %v868_v58 = vmul.f32 0.5, %v867_v12 }
 0x8d3   :  { %v869_v13 = vsub.f32 1.5, %v868_v58 }
 0x8d5   :  { %v870_v14 = vmul.f32 %v2192_v8, %v869_v13  ;;  %v2039_v13 = vld [vmem:[%s2930_s4 + $0x38] sm:$0xff] }
 0x8d6   :  { %1071 = vmatpush.msrb.mxu0 %v2039_v13 }
 0x8d7   :  { %v874_v15 = vsel %vm873_vm1, %v2192_v8, %v870_v14  ;;  %v2038_v14 = vld [vmem:[%s2930_s4 + $0x30] sm:$0xff] }
 0x8d8   :  { %v876_v16 = vmul.f32 %v874_v15, %v842_v39  ;;  %1072 = vmatpush.msrb.mxu0 %v2038_v14  ;;  %v2037_v15 = vld [vmem:[%s2930_s4 + $0x28] sm:$0xff] }
 0x8da   :  { %v881_v17 = vmul.f32 %v2136_v59, %v876_v16  ;;  %v2036_v16 = vld [vmem:[%s2930_s4 + $0x20] sm:$0xff]  ;;  %1073 = vmatpush.msrb.mxu0 %v2037_v15 }
 0x8dc   :  { %v2581_v56 = vadd.f32 %v2137_v63, %v881_v17  ;;  %1074 = vmatpush.msrb.mxu0 %v2036_v16 }
 0x8de   :  { %2035 = vmatmul.msk.f32.gmra.mxu1 %vm65_vm0, %v2581_v56 }
 0x93d   :  { %v918_v32 = vpop.f32.mrf.mxu1 }
 0x93e   :  { %v919_v33 = vadd.f32 %v2138_v26, %v918_v32 }
 0x940   :  { %v924_v34 = vmul.f32 %v919_v33, %v919_v33 }
 0x942   :  { %v926_v35 = vmul.f32 %v924_v34, %v919_v33 }
 0x944   :  { %v928_v36 = vmul.f32 0.044715, %v926_v35 }
 0x946   :  { %v930_v47 = vadd.f32 %v928_v36, %v919_v33 }
 0x948   :  { %v932_v37 = vmul.f32 0.7978846, %v930_v47 }
 0x94a   :  { %2193 = vtanh.f32 %v932_v37 }
 0x950   :  { %v2194_v38 = vpop.eup %2193 }
 0x951   :  { %v936_v61 = vadd.f32 1.0, %v2194_v38 }
 0x953   :  { %v938_v39 = vmul.f32 0.5, %v936_v61 }
 0x955   :  { %v940_v40 = vmul.f32 %v938_v39, %v919_v33 }
 0x957   :  { %978 = vmatmul.f32.vlgmr.msra.gmra.mxu2 %v940_v40 }
 0x95b   :  { %v921_v41 = vpop.f32.mrf.mxu1 }
 0x95c   :  { %v922_v52 = vadd.f32 %v2138_v26, %v921_v41 }
 0x95e   :  { %v925_v42 = vmul.f32 %v922_v52, %v922_v52 }
 0x960   :  { %v927_v43 = vmul.f32 %v925_v42, %v922_v52 }
 0x962   :  { %v929_v44 = vmul.f32 0.044715, %v927_v43 }
 0x964   :  { %v931_v45 = vadd.f32 %v929_v44, %v922_v52 }
 0x966   :  { %v933_v46 = vmul.f32 0.7978846, %v931_v45 }
 0x968   :  { %2195 = vtanh.f32 %v933_v46 }
 0x96e   :  { %v2196_v48 = vpop.eup %2195 }
 0x96f   :  { %v937_v49 = vadd.f32 1.0, %v2196_v48 }
 0x971   :  { %v939_v50 = vmul.f32 0.5, %v937_v49 }
 0x973   :  { %v941_v51 = vmul.f32 %v939_v50, %v922_v52  ;;  %v2142_v52 = vld [vmem:[%s2929_s5 + $0x1] ss:$0 sm:$0xff]  ;;  %s2962_s5 = smov 80  }
 0x975   :  { %981 = vmatmul.f32.gmra.mxu2 %v941_v51 }
 0x9da   :  { %v979_v54 = vpop.f32.mrf.mxu2 }
 0x9db   :  { %v980_v57 = vadd.f32 %v2139_v53, %v979_v54 }
 0x9dd   :  { %v985_v59 = vadd.f32 %v980_v57, %v2567_v55 }
 0x9df   :  { %v989_v60 = vsel %vm65_vm0, %v985_v59, 0.0 }
 0x9e0   :  { %990 = vadd.xlane.f32.xlu0 %v989_v60 }
 0x9f8   :  { %v982_v62 = vpop.f32.mrf.mxu2 }
 0x9f9   :  { %v983_v63 = vadd.f32 %v2139_v53, %v982_v62 }
 0x9fb   :  { %v986_v0 = vadd.f32 %v983_v63, %v2581_v56 }
 0x9fd   :  { %v992_v1 = vsel %vm65_vm0, %v986_v0, 0.0 }
 0x9fe   :  { %993 = vadd.xlane.f32.xlu2 %v992_v1 }
 0xa53   :  { %v991_v2 = vpop.xlane.xlu0 %990 }
 0xa54   :  { %v995_v3 = vmul.f32 %v991_v2, %v2361_v10 }
 0xa56   :  { %v997_v5 = vsub.f32 %v985_v59, %v995_v3 }
 0xa58   :  { %v999_v6 = vmul.f32 %v997_v5, %v997_v5 }
 0xa5a   :  { %v1001_v7 = vsel %vm65_vm0, %v999_v6, 0.0 }
 0xa5b   :  { %1002 = vadd.xlane.f32.xlu0 %v1001_v7 }
 0xa71   :  { %v994_v8 = vpop.xlane.xlu2 %993 }
 0xa72   :  { %v996_v55 = vmul.f32 %v994_v8, %v2361_v10 }
 0xa74   :  { %v998_v11 = vsub.f32 %v986_v0, %v996_v55 }
 0xa76   :  { %v1000_v12 = vmul.f32 %v998_v11, %v998_v11 }
 0xa78   :  { %v1004_v58 = vsel %vm65_vm0, %v1000_v12, 0.0 }
 0xa79   :  { %1005 = vadd.xlane.f32.xlu1 %v1004_v58 }
 0xace   :  { %v1003_v17 = vpop.xlane.xlu0 %1002 }
 0xacf   :  { %v1007_v56 = vmul.f32 %v1003_v17, %v2361_v10 }
 0xad1   :  { %v1009_v18 = vadd.f32 1e-12, %v1007_v56 }
 0xad3   :  { %2197 = vrsqrt.f32 %v1009_v18  ;;  %vm1017_vm3 = vweird.f32 %v1009_v18 }
 0xad9   :  { %v2198_v19 = vpop.eup %2197 }
 0xada   :  { %v1012_v20 = vmul.f32 %v2198_v19, %v1009_v18  ;;  %vm1018_vm2 = vweird.f32 %v2198_v19 }
 0xadb   :  { %vm1019_vm4 = vmor %vm1017_vm3, %vm1018_vm2 }
 0xadc   :  { %v1013_v21 = vmul.f32 %v2198_v19, %v1012_v20 }
 0xade   :  { %v1014_v22 = vmul.f32 0.5, %v1013_v21 }
 0xae0   :  { %v1015_v23 = vsub.f32 1.5, %v1014_v22 }
 0xae2   :  { %v1016_v24 = vmul.f32 %v2198_v19, %v1015_v23 }
 0xae4   :  { %v1020_v27 = vsel %vm1019_vm4, %v2198_v19, %v1016_v24 }
 0xae5   :  { %v1031_v28 = vmul.f32 %v1020_v27, %v997_v5 }
 0xae7   :  { %v1036_v30 = vmul.f32 %v2140_v25, %v1031_v28 }
 0xae9   :  { %v2657_v31 = vadd.f32 %v2141_v29, %v1036_v30 }
 0xaeb   :  { %2041 = vmatmul.msk.f32.vlgmr.msrb.gmra.mxu0 %vm65_vm0, %v2657_v31 }
 0xaec   :  { %v1006_v26 = vpop.xlane.xlu1 %1005 }
 0xaed   :  { %v1008_v32 = vmul.f32 %v1006_v26, %v2361_v10 }
 0xaef   :  { %v1010_v33 = vadd.f32 1e-12, %v1008_v32 }
 0xaf1   :  { %2199 = vrsqrt.f32 %v1010_v33  ;;  %vm1027_vm6 = vweird.f32 %v1010_v33 }
 0xaf7   :  { %v2200_v34 = vpop.eup %2199 }
 0xaf8   :  { %v1022_v35 = vmul.f32 %v2200_v34, %v1010_v33  ;;  %vm1028_vm5 = vweird.f32 %v2200_v34 }
 0xaf9   :  { %vm1029_vm7 = vmor %vm1027_vm6, %vm1028_vm5  ;;  %vm1961_vm5 = vcmask 1040384   ;;  %vm1994_vm6 = vcmask 1024  }
 0xafa   :  { %v1023_v36 = vmul.f32 %v2200_v34, %v1022_v35 }
 0xafc   :  { %v1024_v47 = vmul.f32 0.5, %v1023_v36 }
 0xafe   :  { %v1025_v37 = vsub.f32 1.5, %v1024_v47 }
 0xb00   :  { %v1026_v38 = vmul.f32 %v2200_v34, %v1025_v37 }
 0xb02   :  { %v1030_v61 = vsel %vm1029_vm7, %v2200_v34, %v1026_v38 }
 0xb03   :  { %v1032_v39 = vmul.f32 %v1030_v61, %v998_v11 }
 0xb05   :  { %v1037_v40 = vmul.f32 %v2140_v25, %v1032_v39 }
 0xb07   :  { %v2662_v41 = vadd.f32 %v2141_v29, %v1037_v40  ;;  %v2043_v29 = vld [vmem:[%s2932_s6 + $0x20] sm:$0xff] }
 0xb09   :  { %2042 = vmatmul.msk.f32.gmra.mxu0 %vm65_vm0, %v2662_v41 }
 0xb68   :  { %v1076_v42 = vpop.f32.mrf.mxu0 }
 0xb69   :  { %v2669_v43 = vadd.f32 %v2142_v52, %v1076_v42  ;;  %v2044_v42 = vld [vmem:[%s2932_s6 + $0x28] sm:$0xff] }
 0xb6a   :  { %1370 = vmatpush.msrb.mxu2 %v2044_v42 }
 0xb6b   :  { %1221 = vrot.lane.b32.xlu1 %v2669_v43, %s2246_s2  ;;  %1090 = vrot.lane.b32.xlu2 %v2669_v43, %s2247_s20  ;;  %v2680_v46 = vmul.f32 0.35355338, %v2669_v43 }
 0xb86   :  { %v1079_v44 = vpop.f32.mrf.mxu0 }
 0xb87   :  { %v2675_v45 = vadd.f32 %v2142_v52, %v1079_v44 }
 0xb89   :  { %1118 = vrot.lane.b32.xlu0 %v2675_v45, %s2247_s20  ;;  %v2690_v51 = vmul.f32 0.35355338, %v2675_v45  ;;  %v2127_v3 = vpack.i.bf16 %v2669_v43, %v2675_v45 }
 0xb91   :  { %1219 = vrot.lane.b32.xlu0 %v2680_v46, %s2248_s21 }
 0xbc5   :  { %v1091_v48 = vpop.permute.xlu2 %1090 }
 0xbc6   :  { %2047 = vmatpush.xpose.msk.msra.mxu3 %vm185_vm8, %v1091_v48 }
 0xbc9   :  { %2048 = vmatmul.msk.f32.vlgmr.msra.gmra.mxu3 %vm185_vm8, %v2680_v46 }
 0xbdd   :  { %v1222_v50 = vpop.permute.xlu1 %1221 }
 0xbfb   :  { %v1119_v49 = vpop.permute.xlu0 %1118 }
 0xbfc   :  { %2049 = vmatpush.xpose.msk.msrb.mxu1 %vm185_vm8, %v1119_v49 }
 0xbff   :  { %2050 = vmatmul.msk.f32.vlgmr.msrb.gmra.mxu1 %vm185_vm8, %v2690_v51 }
 0xc00   :  { %2053 = vmatpush.xpose.msk.msra.mxu1 %vm185_vm8, %v1222_v50 }
 0xc03   :  { %v1220_v53 = vpop.permute.xlu0 %1219 }
 0xc07   :  { %2054 = vmatmul.msk.f32.vlgmr.msra.gmra.mxu1 %vm185_vm8, %v1220_v53 }
 0xc4c   :  { %v1114_v54 = vpop.f32.mrf.mxu3 }
 0xc4d   :  { %v1115_v57 = vadd.f32 %v1114_v54, %v2430_v4 }
 0xc4f   :  { %v1145_v59 = vsel %vm185_vm8, %v1115_v57, -inf }
 0xc50   :  { %1146 = vmax.xlane.f32.xlu0 %v1145_v59 }
 0xc64   :  { %1249 = vrot.lane.b32.xlu0 %v2675_v45, %s2246_s2  ;;  %s2963_s2 = smov 72  }
 0xc7c   :  { %v1142_v60 = vpop.f32.mrf.mxu1 }
 0xc7d   :  { %v1143_v62 = vadd.f32 %v1142_v60, %v2434_v9 }
 0xc7f   :  { %v1148_v63 = vsel %vm185_vm8, %v1143_v62, -inf }
 0xc80   :  { %1149 = vmax.xlane.f32.xlu2 %v1148_v63 }
 0xc84   :  { %v1244_v0 = vpop.f32.mrf.mxu1 }
 0xc85   :  { %v1245_v1 = vadd.f32 %v1244_v0, %v2430_v4 }
 0xc87   :  { %v1275_v2 = vsel %vm185_vm8, %v1245_v1, -inf }
 0xc88   :  { %1276 = vmax.xlane.f32.xlu1 %v1275_v2 }
 0xc98   :  { %1297 = vrot.lane.b32.xlu2 %v2669_v43, %s2252_s26 }
 0xca1   :  { %2128 = vrot.lane.b32.xlu1 %v2127_v3, %s2250_s1 }
 0xca9   :  { %1247 = vrot.lane.b32.xlu1 %v2690_v51, %s2248_s21 }
 0xcc3   :  { %v1147_v5 = vpop.xlane.xlu0 %1146 }
 0xcc4   :  { %v1151_v6 = vsub.f32 %v1115_v57, %v1147_v5 }
 0xcc6   :  { %v1153_v7 = vmul.f32 1.442695, %v1151_v6 }
 0xcc8   :  { %2201 = vpow2.f32 %v1153_v7 }
 0xcce   :  { %v2202_v8 = vpop.eup %2201 }
 0xccf   :  { %v1157_v55 = vsel %vm185_vm8, %v2202_v8, 0.0 }
 0xcd0   :  { %1158 = vadd.xlane.f32.xlu2 %v1157_v55 }
 0xcd6   :  { %v1250_v22 = vpop.permute.xlu0 %1249 }
 0xcf3   :  { %v1150_v11 = vpop.xlane.xlu2 %1149 }
 0xcf4   :  { %v1152_v12 = vsub.f32 %v1143_v62, %v1150_v11 }
 0xcf6   :  { %v1155_v58 = vmul.f32 1.442695, %v1152_v12 }
 0xcf8   :  { %2203 = vpow2.f32 %v1155_v58 }
 0xcfb   :  { %v1277_v13 = vpop.xlane.xlu1 %1276  ;;  %v1298_v23 = vpop.permute.xlu2 %1297 }
 0xcfc   :  { %v1281_v14 = vsub.f32 %v1245_v1, %v1277_v13 }
 0xcfe   :  { %v2204_v15 = vpop.eup %2203  ;;  %v1283_v16 = vmul.f32 1.442695, %v1281_v14 }
 0xcff   :  { %v1160_v17 = vsel %vm185_vm8, %v2204_v15, 0.0 }
 0xd00   :  { %2205 = vpow2.f32 %v1283_v16  ;;  %1161 = vadd.xlane.f32.xlu2 %v1160_v17 }
 0xd06   :  { %v2206_v56 = vpop.eup %2205 }
 0xd07   :  { %v1287_v18 = vsel %vm185_vm8, %v2206_v56, 0.0 }
 0xd08   :  { %1288 = vadd.xlane.f32.xlu0 %v1287_v18 }
 0xd13   :  { %v2129_v19 = vpop.permute.xlu1 %2128 }
 0xd14   :  { %v2131_v20 = vunpack.i.h.bf16 %v2129_v19  ;;  %v2130_v21 = vunpack.i.l.bf16 %v2129_v19 }
 0xd16   :  { %1188 = vmatpush.msra.mxu0 %v2131_v20  ;;  %1214 = vmatpush.msrb.mxu3 %v2130_v21 }
 0xd18   :  { %2055 = vmatpush.xpose.msk.msrb.mxu0 %vm185_vm8, %v1250_v22  ;;  %1318 = vmatpush.msra.mxu3 %v1298_v23 }
 0xd19   :  { %1407 = vrot.lane.b32.xlu2 %v2680_v46, %s2253_s27 }
 0xd1b   :  { %v1248_v28 = vpop.permute.xlu1 %1247 }
 0xd1c   :  { %1409 = vrot.lane.b32.xlu0 %v2669_v43, %s2962_s5 }
 0xd21   :  { %1437 = vrot.lane.b32.xlu2 %v2675_v45, %s2962_s5 }
 0xd29   :  { %1570 = vrot.lane.b32.xlu2 %v2669_v43, %s2963_s2 }
 0xd43   :  { %v1159_v24 = vpop.xlane.xlu2 %1158 }
 0xd44   :  { %2207 = vrcp.f32 %v1159_v24 }
 0xd4a   :  { %v2208_v25 = vpop.eup %2207 }
 0xd4b   :  { %v1165_v27 = vmul.f32 %v2208_v25, %v2202_v8 }
 0xd4d   :  { %2051 = vmatmul.msk.f32.vlgmr.msra.gmra.mxu0 %vm185_vm8, %v1165_v27 }
 0xd4e   :  { %1399 = vmatpush.msra.mxu0 %v2043_v29 }
 0xd55   :  { %2056 = vmatmul.msk.f32.vlgmr.msrb.gmra.mxu0 %vm185_vm8, %v1248_v28  ;;  %v2045_v28 = vld [vmem:[%s2932_s6 + $0x30] sm:$0xff] }
 0xd56   :  { %1558 = vmatpush.msra.mxu2 %v2045_v28  ;;  %v2082_v28 = vld [vmem:[%s2937_s10 + $0x20] sm:$0xff] }
 0xd73   :  { %v1162_v30 = vpop.xlane.xlu2 %1161 }
 0xd74   :  { %2209 = vrcp.f32 %v1162_v30 }
 0xd7a   :  { %v2210_v26 = vpop.eup %2209 }
 0xd7b   :  { %v1166_v32 = vmul.f32 %v2210_v26, %v2204_v15  ;;  %v1408_v33 = vpop.permute.xlu2 %1407  ;;  %v1289_v34 = vpop.xlane.xlu0 %1288 }
 0xd7c   :  { %2211 = vrcp.f32 %v1289_v34 }
 0xd7d   :  { %2052 = vmatmul.msk.f32.vlgmr.msrb.gmra.mxu3 %vm185_vm8, %v1166_v32 }
 0xd82   :  { %v2212_v35 = vpop.eup %2211 }
 0xd83   :  { %v1295_v36 = vmul.f32 %v2212_v35, %v2206_v56  ;;  %v1438_v47 = vpop.permute.xlu2 %1437 }
 0xd85   :  { %2057 = vmatmul.msk.f32.vlgmr.msra.gmra.mxu3 %vm185_vm8, %v1295_v36 }
 0xd8b   :  { %v1571_v37 = vpop.permute.xlu2 %1570 }
 0xd8c   :  { %2071 = vmatpush.xpose.msk.msrb.mxu0 %vm185_vm8, %v1571_v37 }
 0xd8e   :  { %v1410_v38 = vpop.permute.xlu0 %1409 }
 0xd8f   :  { %2063 = vmatpush.xpose.msk.msrb.mxu3 %vm185_vm8, %v1410_v38 }
 0xd92   :  { %2064 = vmatmul.msk.f32.vlgmr.msrb.gmra.mxu3 %vm185_vm8, %v1408_v33 }
 0xdca   :  { %v1190_v61 = vpop.f32.mrf.mxu0 }
 0xdcb   :  { %2061 = vmatmul.msk.f32.vlgmr.msra.gmra.mxu0 %vm185_vm8, %v1190_v61 }
 0xdd2   :  { %v1272_v39 = vpop.f32.mrf.mxu0 }
 0xdd3   :  { %v1273_v40 = vadd.f32 %v1272_v39, %v2434_v9 }
 0xdd5   :  { %v1278_v52 = vsel %vm185_vm8, %v1273_v40, -inf }
 0xdd6   :  { %1279 = vmax.xlane.f32.xlu1 %v1278_v52 }
 0xdef   :  { %1323 = vrot.lane.b32.xlu1 %v2675_v45, %s2252_s26 }
 0xdf7   :  { %1485 = vrot.lane.b32.xlu1 %v2669_v43, %s2964_s0 }
 0xdff   :  { %1568 = vrot.lane.b32.xlu1 %v2680_v46, %s2965_s23 }
 0xe00   :  { %v1216_v44 = vpop.f32.mrf.mxu3 }
 0xe01   :  { %2062 = vmatmul.msk.f32.gmra.mxu0 %vm185_vm8, %v1216_v44 }
 0xe08   :  { %v1320_v48 = vpop.f32.mrf.mxu3 }
 0xe09   :  { %2059 = vmatmul.msk.f32.vlgmr.msrb.gmra.mxu2 %vm185_vm8, %v1320_v48 }
 0xe15   :  { %v1432_v49 = vpop.f32.mrf.mxu3 }
 0xe16   :  { %v1433_v50 = vadd.f32 %v1432_v49, %v2430_v4 }
 0xe18   :  { %v1463_v53 = vsel %vm185_vm8, %v1433_v50, -inf }
 0xe19   :  { %1464 = vmax.xlane.f32.xlu0 %v1463_v53 }
 0xe2d   :  { %1435 = vrot.lane.b32.xlu0 %v2690_v51, %s2253_s27 }
 0xe48   :  { %v2760_v11 = vpop.f32.mrf.mxu0 }
 0xe49   :  { %v1280_v54 = vpop.xlane.xlu1 %1279 }
 0xe4a   :  { %v1282_v57 = vsub.f32 %v1273_v40, %v1280_v54 }
 0xe4c   :  { %v1285_v59 = vmul.f32 1.442695, %v1282_v57 }
 0xe4e   :  { %2213 = vpow2.f32 %v1285_v59 }
 0xe54   :  { %v2214_v46 = vpop.eup %2213 }
 0xe55   :  { %v1290_v60 = vsel %vm185_vm8, %v2214_v46, 0.0 }
 0xe56   :  { %1291 = vadd.xlane.f32.xlu2 %v1290_v60 }
 0xe61   :  { %v1324_v62 = vpop.permute.xlu1 %1323 }
 0xe62   :  { %1344 = vmatpush.msrb.mxu1 %v1324_v62 }
 0xe64   :  { %2065 = vmatpush.xpose.msk.msra.mxu1 %vm185_vm8, %v1438_v47 }
 0xe69   :  { %v1486_v63 = vpop.permute.xlu1 %1485 }
 0xe6a   :  { %1506 = vmatpush.msra.mxu3 %v1486_v63 }
 0xe6e   :  { %1596 = vrot.lane.b32.xlu2 %v2690_v51, %s2965_s23 }
 0xe71   :  { %v1569_v0 = vpop.permute.xlu1 %1568 }
 0xe72   :  { %2072 = vmatmul.msk.f32.vlgmr.msrb.gmra.mxu0 %vm185_vm8, %v1569_v0 }
 0xe7e   :  { %v2762_v12 = vpop.f32.mrf.mxu0 }
 0xe8c   :  { %v1465_v1 = vpop.xlane.xlu0 %1464  ;;  %v1372_v63 = vpop.f32.mrf.mxu2 }
 0xe8d   :  { %v1469_v2 = vsub.f32 %v1433_v50, %v1465_v1 }
 0xe8f   :  { %v1471_v3 = vmul.f32 1.442695, %v1469_v2  ;;  %v1402_v2 = vadd.f32 %v2760_v11, %v1372_v63 }
 0xe91   :  { %2215 = vpow2.f32 %v1471_v3 }
 0xe97   :  { %v2216_v5 = vpop.eup %2215 }
 0xe98   :  { %v1475_v6 = vsel %vm185_vm8, %v2216_v5, 0.0 }
 0xe99   :  { %1476 = vadd.xlane.f32.xlu0 %v1475_v6 }
 0xe9f   :  { %v1436_v51 = vpop.permute.xlu0 %1435 }
 0xead   :  { %1598 = vrot.lane.b32.xlu0 %v2675_v45, %s2963_s2 }
 0xec9   :  { %v1292_v7 = vpop.xlane.xlu2 %1291 }
 0xeca   :  { %2217 = vrcp.f32 %v1292_v7 }
 0xed0   :  { %v2218_v8 = vpop.eup %2217 }
 0xed1   :  { %v1296_v55 = vmul.f32 %v2218_v8, %v2214_v46  ;;  %v1597_v18 = vpop.permute.xlu2 %1596 }
 0xed3   :  { %2058 = vmatmul.msk.f32.vlgmr.msrb.gmra.mxu1 %vm185_vm8, %v1296_v55 }
 0xedb   :  { %2066 = vmatmul.msk.f32.vlgmr.msra.gmra.mxu1 %vm185_vm8, %v1436_v51 }
 0xeef   :  { %v1593_v58 = vpop.f32.mrf.mxu0 }
 0xef0   :  { %v1594_v13 = vadd.f32 %v1593_v58, %v2430_v4 }
 0xef2   :  { %v1624_v14 = vsel %vm185_vm8, %v1594_v13, -inf }
 0xef3   :  { %1625 = vmax.xlane.f32.xlu1 %v1624_v14 }
 0xf0c   :  { %v1477_v15 = vpop.xlane.xlu0 %1476 }
 0xf0d   :  { %2219 = vrcp.f32 %v1477_v15 }
 0xf13   :  { %v2220_v16 = vpop.eup %2219 }
 0xf14   :  { %v1483_v17 = vmul.f32 %v2220_v16, %v2216_v5  ;;  %v2143_v5 = vld [vmem:[%s2933_s7 + $0x1] ss:$0 sm:$0xff] }
 0xf16   :  { %2067 = vmatmul.msk.f32.vlgmr.msra.gmra.mxu3 %vm185_vm8, %v1483_v17 }
 0xf1f   :  { %v1599_v56 = vpop.permute.xlu0 %1598 }
 0xf20   :  { %2073 = vmatpush.xpose.msk.msrb.mxu3 %vm185_vm8, %v1599_v56 }
 0xf23   :  { %2074 = vmatmul.msk.f32.vlgmr.msrb.gmra.mxu3 %vm185_vm8, %v1597_v18 }
 0xf50   :  { %v1346_v19 = vpop.f32.mrf.mxu1 }
 0xf51   :  { %2060 = vmatmul.msk.f32.gmra.mxu2 %vm185_vm8, %v1346_v19 }
 0xf58   :  { %v1460_v20 = vpop.f32.mrf.mxu1 }
 0xf59   :  { %v1461_v4 = vadd.f32 %v1460_v20, %v2434_v9 }
 0xf5b   :  { %v1466_v21 = vsel %vm185_vm8, %v1461_v4, -inf }
 0xf5c   :  { %1467 = vmax.xlane.f32.xlu0 %v1466_v21 }
 0xf66   :  { %v1626_v22 = vpop.xlane.xlu1 %1625 }
 0xf67   :  { %v1630_v23 = vsub.f32 %v1594_v13, %v1626_v22 }
 0xf69   :  { %v1632_v24 = vmul.f32 1.442695, %v1630_v23 }
 0xf6b   :  { %2221 = vpow2.f32 %v1632_v24 }
 0xf71   :  { %v2222_v25 = vpop.eup %2221 }
 0xf72   :  { %v1636_v27 = vsel %vm185_vm8, %v2222_v25, 0.0 }
 0xf73   :  { %1637 = vadd.xlane.f32.xlu1 %v1636_v27  ;;  %v2083_v27 = vld [vmem:[%s2937_s10 + $0x28] sm:$0xff] }
 0xf8c   :  { %1646 = vrot.lane.b32.xlu1 %v2669_v43, %s2966_s28 }
 0xf99   :  { %v1508_v29 = vpop.f32.mrf.mxu3 }
 0xf9a   :  { %2069 = vmatmul.msk.f32.vlgmr.msra.gmra.mxu2 %vm185_vm8, %v1508_v29 }
 0xfa6   :  { %v1621_v30 = vpop.f32.mrf.mxu3 }
 0xfa7   :  { %v1622_v26 = vadd.f32 %v1621_v30, %v2434_v9 }
 0xfa9   :  { %v1627_v32 = vsel %vm185_vm8, %v1622_v26, -inf }
 0xfaa   :  { %1628 = vmax.xlane.f32.xlu2 %v1627_v32 }
 0xfc2   :  { %1511 = vrot.lane.b32.xlu2 %v2675_v45, %s2964_s0 }
 0xfcf   :  { %v1468_v33 = vpop.xlane.xlu0 %1467 }
 0xfd0   :  { %v1470_v34 = vsub.f32 %v1461_v4, %v1468_v33 }
 0xfd2   :  { %v1473_v35 = vmul.f32 1.442695, %v1470_v34 }
 0xfd4   :  { %2223 = vpow2.f32 %v1473_v35  ;;  %v1375_v0 = vpop.f32.mrf.mxu2 }
 0xfd5   :  { %v1405_v13 = vadd.f32 %v2762_v12, %v1375_v0  ;;  %v2101_v0 = vld [vmem:[%s2938_s12 + $0xe0] sm:$0xff] }
 0xfda   :  { %v2224_v36 = vpop.eup %2223 }
 0xfdb   :  { %v1478_v47 = vsel %vm185_vm8, %v2224_v36, 0.0 }
 0xfdc   :  { %1479 = vadd.xlane.f32.xlu0 %v1478_v47 }
 0xfe6   :  { %v1638_v37 = vpop.xlane.xlu1 %1637 }
 0xffe   :  { %v1647_v39 = vpop.permute.xlu1 %1646 }
0x101d   :  { %v1629_v43 = vpop.xlane.xlu2 %1628  ;;  %v1560_v1 = vpop.f32.mrf.mxu2 }
0x101e   :  { %v1631_v38 = vsub.f32 %v1622_v26, %v1629_v43  ;;  %v1566_v3 = vadd.f32 %v1560_v1, %v1402_v2  ;;  %v2144_v43 = vld [vmem:[%s2934_s8 + $0x1] ss:$0 sm:$0xff]  ;;  %v2100_v1 = vld [vmem:[%s2938_s12 + $0xd8] sm:$0xff]  ;;  %v2099_v2 = vld [vmem:[%s2938_s12 + $0xd0] sm:$0xff] }
0x1020   :  { %v1634_v61 = vmul.f32 1.442695, %v1631_v38 }
0x1022   :  { %2225 = vpow2.f32 %v1634_v61  ;;  %v2145_v61 = vld [vmem:[%s2935_s9 + $0x1] ss:$0 sm:$0xff] }
0x1025   :  { %v1512_v9 = vpop.permute.xlu2 %1511 }
0x1026   :  { %1532 = vmatpush.msrb.mxu1 %v1512_v9 }
0x1028   :  { %1667 = vmatpush.msra.mxu1 %v1647_v39  ;;  %v2226_v40 = vpop.eup %2225 }
0x1029   :  { %v1639_v52 = vsel %vm185_vm8, %v2226_v40, 0.0 }
0x102a   :  { %1640 = vadd.xlane.f32.xlu0 %v1639_v52  ;;  %v2103_v52 = vld [vmem:[%s2938_s12 + $0xf0] sm:$0xff] }
0x103e   :  { %1672 = vrot.lane.b32.xlu0 %v2675_v45, %s2966_s28  ;;  %v2046_v45 = vld [vmem:[%s2932_s6 + $0x38] sm:$0xff] }
0x103f   :  { %1719 = vmatpush.msra.mxu3 %v2046_v45 }
0x104f   :  { %v1480_v42 = vpop.xlane.xlu0 %1479 }
0x1050   :  { %2227 = vrcp.f32 %v1480_v42  ;;  %v2102_v42 = vld [vmem:[%s2938_s12 + $0xe8] sm:$0xff] }
0x1051   :  { %2229 = vrcp.f32 %v1638_v37 }
0x1056   :  { %v2228_v44 = vpop.eup %2227 }
0x1057   :  { %v1484_v48 = vmul.f32 %v2228_v44, %v2224_v36  ;;  %v2230_v49 = vpop.eup %2229 }
0x1058   :  { %v1644_v50 = vmul.f32 %v2230_v49, %v2222_v25  ;;  %v2084_v25 = vld [vmem:[%s2937_s10 + $0x30] sm:$0xff] }
0x1059   :  { %2068 = vmatmul.msk.f32.vlgmr.msrb.gmra.mxu1 %vm185_vm8, %v1484_v48 }
0x1061   :  { %2075 = vmatmul.msk.f32.vlgmr.msra.gmra.mxu1 %vm185_vm8, %v1644_v50 }
0x109d   :  { %v1641_v53 = vpop.xlane.xlu0 %1640 }
0x109e   :  { %2231 = vrcp.f32 %v1641_v53 }
0x10a4   :  { %v2232_v54 = vpop.eup %2231 }
0x10a5   :  { %v1645_v57 = vmul.f32 %v2232_v54, %v2226_v40  ;;  %v2104_v40 = vld [vmem:[%s2938_s12 + $0xf8] sm:$0xff] }
0x10a6   :  { %1875 = vmatpush.msrb.mxu2 %v2104_v40 }
0x10a8   :  { %1876 = vmatpush.msrb.mxu2 %v2103_v52 }
0x10aa   :  { %1877 = vmatpush.msrb.mxu2 %v2102_v42 }
0x10ac   :  { %1878 = vmatpush.msrb.mxu2 %v2101_v0 }
0x10ae   :  { %1879 = vmatpush.msrb.mxu2 %v2100_v1 }
0x10b0   :  { %v1673_v59 = vpop.permute.xlu0 %1672  ;;  %1880 = vmatpush.msrb.mxu2 %v2099_v2  ;;  %v23_v2 = vstv %s2943_s17 }
0x10b1   :  { %1693 = vmatpush.msra.mxu0 %v1673_v59  ;;  %24 = vst [vmem:[#allocation2] sm:$0x1] %v23_v2 }
0x10b2   :  { %2076 = vmatmul.msk.f32.vlgmr.msra.gmra.mxu0 %vm185_vm8, %v1645_v57 }
0x10d6   :  { %v1534_v46 = vpop.f32.mrf.mxu1 }
0x10d7   :  { %2070 = vmatmul.msk.f32.gmra.mxu2 %vm185_vm8, %v1534_v46 }
0x10de   :  { %v1669_v60 = vpop.f32.mrf.mxu1 }
0x10df   :  { %2077 = vmatmul.msk.f32.vlgmr.msra.gmra.mxu3 %vm185_vm8, %v1669_v60 }
0x112f   :  { %v1695_v62 = vpop.f32.mrf.mxu0 }
0x1130   :  { %2078 = vmatmul.msk.f32.gmra.mxu3 %vm185_vm8, %v1695_v62 }
0x115a   :  { %v1563_v58 = vpop.f32.mrf.mxu2 }
0x115b   :  { %v1567_v14 = vadd.f32 %v1563_v58, %v1405_v13  ;;  %v2091_v58 = vld [vmem:[%s2938_s12 + $0x90] sm:$0xff]  ;;  %v2090_v13 = vld [vmem:[%s2938_s12 + $0x88] sm:$0xff] }
0x1162   :  { %v1721_v6 = vpop.f32.mrf.mxu3 }
0x1163   :  { %v1727_v7 = vadd.f32 %v1721_v6, %v1566_v3  ;;  %v2098_v3 = vld [vmem:[%s2938_s12 + $0xc8] sm:$0xff]  ;;  %v2096_v6 = vld [vmem:[%s2938_s12 + $0xb8] sm:$0xff] }
0x1164   :  { %1881 = vmatpush.msrb.mxu2 %v2098_v3 }
0x1165   :  { %v1734_v8 = vadd.f32 %v2143_v5, %v1727_v7  ;;  %v2095_v7 = vld [vmem:[%s2938_s12 + $0xb0] sm:$0xff] }
0x1167   :  { %v1736_v55 = vadd.f32 %v1734_v8, %v2657_v31  ;;  %v2094_v8 = vld [vmem:[%s2938_s12 + $0xa8] sm:$0xff] }
0x1169   :  { %v1742_v51 = vsel %vm65_vm0, %v1736_v55, 0.0 }
0x116a   :  { %1743 = vadd.xlane.f32.xlu2 %v1742_v51  ;;  %v2092_v51 = vld [vmem:[%s2938_s12 + $0x98] sm:$0xff] }
0x11b3   :  { %v1724_v15 = vpop.f32.mrf.mxu3 }
0x11b4   :  { %v1728_v16 = vadd.f32 %v1724_v15, %v1567_v14  ;;  %v2089_v14 = vld [vmem:[%s2938_s12 + $0x80] sm:$0xff] }
0x11b5   :  { %v2146_v15 = vld [vmem:[%s2936_s11 + $0x1] ss:$0 sm:$0xff] }
0x11b6   :  { %v1735_v11 = vadd.f32 %v2143_v5, %v1728_v16  ;;  %v2097_v5 = vld [vmem:[%s2938_s12 + $0xc0] sm:$0xff] }
0x11b7   :  { %1882 = vmatpush.msrb.mxu2 %v2097_v5 }
0x11b8   :  { %v1737_v17 = vadd.f32 %v1735_v11, %v2662_v41  ;;  %v2085_v41 = vld [vmem:[%s2937_s10 + $0x38] sm:$0xff] }
0x11b9   :  { %1824 = vmatpush.msrb.mxu1 %v2085_v41  ;;  %1883 = vmatpush.msrb.mxu2 %v2096_v6 }
0x11ba   :  { %v1745_v56 = vsel %vm65_vm0, %v1737_v17, 0.0 }
0x11bb   :  { %1746 = vadd.xlane.f32.xlu0 %v1745_v56  ;;  %1825 = vmatpush.msrb.mxu1 %v2084_v25 }
0x11bc   :  { %1884 = vmatpush.msrb.mxu2 %v2095_v7 }
0x11bd   :  { %1826 = vmatpush.msrb.mxu1 %v2083_v27 }
0x11be   :  { %1885 = vmatpush.msrb.mxu2 %v2094_v8 }
0x11bf   :  { %1827 = vmatpush.msrb.mxu1 %v2082_v28 }
0x11dd   :  { %v1744_v18 = vpop.xlane.xlu2 %1743 }
0x11de   :  { %v1748_v19 = vmul.f32 %v1744_v18, %v2361_v10 }
0x11e0   :  { %v1750_v20 = vsub.f32 %v1736_v55, %v1748_v19  ;;  %v2093_v55 = vld [vmem:[%s2938_s12 + $0xa0] sm:$0xff] }
0x11e1   :  { %1886 = vmatpush.msrb.mxu2 %v2093_v55 }
0x11e2   :  { %v1752_v31 = vmul.f32 %v1750_v20, %v1750_v20 }
0x11e3   :  { %1887 = vmatpush.msrb.mxu2 %v2092_v51 }
0x11e4   :  { %v1754_v4 = vsel %vm65_vm0, %v1752_v31, 0.0 }
0x11e5   :  { %1755 = vadd.xlane.f32.xlu1 %v1754_v4  ;;  %1888 = vmatpush.msrb.mxu2 %v2091_v58 }
0x11e7   :  { %1889 = vmatpush.msrb.mxu2 %v2090_v13 }
0x11e9   :  { %1890 = vmatpush.msrb.mxu2 %v2089_v14 }
0x122e   :  { %v1747_v21 = vpop.xlane.xlu0 %1746 }
0x122f   :  { %v1749_v12 = vmul.f32 %v1747_v21, %v2361_v10 }
0x1231   :  { %v1751_v22 = vsub.f32 %v1737_v17, %v1749_v12 }
0x1233   :  { %v1753_v23 = vmul.f32 %v1751_v22, %v1751_v22 }
0x1235   :  { %v1757_v24 = vsel %vm65_vm0, %v1753_v23, 0.0 }
0x1236   :  { %1758 = vadd.xlane.f32.xlu2 %v1757_v24 }
0x1258   :  { %v1756_v29 = vpop.xlane.xlu1 %1755 }
0x1259   :  { %v1760_v30 = vmul.f32 %v1756_v29, %v2361_v10 }
0x125b   :  { %v1762_v26 = vadd.f32 1e-12, %v1760_v30 }
0x125d   :  { %2233 = vrsqrt.f32 %v1762_v26  ;;  %vm1770_vm9 = vweird.f32 %v1762_v26 }
0x1263   :  { %v2234_v32 = vpop.eup %2233 }
0x1264   :  { %v1765_v33 = vmul.f32 %v2234_v32, %v1762_v26  ;;  %vm1771_vm8 = vweird.f32 %v2234_v32 }
0x1265   :  { %vm1772_vm10 = vmor %vm1770_vm9, %vm1771_vm8 }
0x1266   :  { %v1766_v34 = vmul.f32 %v2234_v32, %v1765_v33  ;;  %v2147_v33 = vld [vmem:[%s2939_s13 + $0x1] ss:$0 sm:$0xff] }
0x1268   :  { %v1767_v35 = vmul.f32 0.5, %v1766_v34 }
0x126a   :  { %v1768_v36 = vsub.f32 1.5, %v1767_v35 }
0x126c   :  { %v1769_v47 = vmul.f32 %v2234_v32, %v1768_v36 }
0x126e   :  { %v1773_v37 = vsel %vm1772_vm10, %v2234_v32, %v1769_v47 }
0x126f   :  { %v1784_v38 = vmul.f32 %v1773_v37, %v1750_v20 }
0x1271   :  { %v1789_v9 = vmul.f32 %v2144_v43, %v1784_v38 }
0x1273   :  { %v2828_v39 = vadd.f32 %v2145_v61, %v1789_v9 }
0x1275   :  { %2087 = vmatmul.msk.f32.vlgmr.msrb.gmra.mxu1 %vm65_vm0, %v2828_v39 }
0x12a9   :  { %v1759_v44 = vpop.xlane.xlu2 %1758 }
0x12aa   :  { %v1761_v48 = vmul.f32 %v1759_v44, %v2361_v10 }
0x12ac   :  { %v1763_v49 = vadd.f32 1e-12, %v1761_v48 }
0x12ae   :  { %2235 = vrsqrt.f32 %v1763_v49  ;;  %vm1780_vm12 = vweird.f32 %v1763_v49 }
0x12b4   :  { %v2236_v50 = vpop.eup %2235 }
0x12b5   :  { %v1775_v53 = vmul.f32 %v2236_v50, %v1763_v49  ;;  %vm1781_vm11 = vweird.f32 %v2236_v50 }
0x12b6   :  { %vm1782_vm13 = vmor %vm1780_vm12, %vm1781_vm11 }
0x12b7   :  { %v1776_v54 = vmul.f32 %v2236_v50, %v1775_v53 }
0x12b9   :  { %v1777_v57 = vmul.f32 0.5, %v1776_v54 }
0x12bb   :  { %v1778_v59 = vsub.f32 1.5, %v1777_v57 }
0x12bd   :  { %v1779_v45 = vmul.f32 %v2236_v50, %v1778_v59 }
0x12bf   :  { %v1783_v46 = vsel %vm1782_vm13, %v2236_v50, %v1779_v45  ;;  %v1966_v45 = vld [vmem:[%s2942_s16 + $0x18] sm:$0xff] }
0x12c0   :  { %v1785_v60 = vmul.f32 %v1783_v46, %v1751_v22  ;;  %v1965_v46 = vld [vmem:[%s2942_s16 + $0x10] sm:$0xff]  ;;  %1986 = vmatpush.msrb.mxu0 %v1966_v45 }
0x12c2   :  { %v1790_v62 = vmul.f32 %v2144_v43, %v1785_v60  ;;  %1987 = vmatpush.msrb.mxu0 %v1965_v46 }
0x12c4   :  { %v2842_v63 = vadd.f32 %v2145_v61, %v1790_v62  ;;  %v1964_v62 = vld [vmem:[%s2942_s16 + $0x8] sm:$0xff] }
0x12c5   :  { %1988 = vmatpush.msrb.mxu0 %v1964_v62 }
0x12c6   :  { %2088 = vmatmul.msk.f32.gmra.mxu1 %vm65_vm0, %v2842_v63 }
0x12f2   :  { %v1829_v16 = vpop.f32.mrf.mxu1 }
0x12f3   :  { %v1830_v11 = vadd.f32 %v2146_v15, %v1829_v16 }
0x12f5   :  { %v1835_v17 = vmul.f32 %v1830_v11, %v1830_v11 }
0x12f7   :  { %v1837_v56 = vmul.f32 %v1835_v17, %v1830_v11 }
0x12f9   :  { %v1839_v18 = vmul.f32 0.044715, %v1837_v56 }
0x12fb   :  { %v1841_v19 = vadd.f32 %v1839_v18, %v1830_v11 }
0x12fd   :  { %v1843_v20 = vmul.f32 0.7978846, %v1841_v19 }
0x12ff   :  { %2237 = vtanh.f32 %v1843_v20 }
0x1305   :  { %v2238_v31 = vpop.eup %2237 }
0x1306   :  { %v1847_v4 = vadd.f32 1.0, %v2238_v31  ;;  %v2149_v31 = vld [vmem:[%s2941_s15 + $0x1] ss:$0 sm:$0xff] }
0x1308   :  { %v1849_v21 = vmul.f32 0.5, %v1847_v4 }
0x130a   :  { %v1851_v12 = vmul.f32 %v1849_v21, %v1830_v11 }
0x130c   :  { %1891 = vmatmul.f32.vlgmr.msrb.gmra.mxu2 %v1851_v12 }
0x1343   :  { %v1832_v22 = vpop.f32.mrf.mxu1 }
0x1344   :  { %v1833_v23 = vadd.f32 %v2146_v15, %v1832_v22 }
0x1346   :  { %v1836_v24 = vmul.f32 %v1833_v23, %v1833_v23 }
0x1348   :  { %v1838_v41 = vmul.f32 %v1836_v24, %v1833_v23 }
0x134a   :  { %v1840_v25 = vmul.f32 0.044715, %v1838_v41 }
0x134c   :  { %v1842_v27 = vadd.f32 %v1840_v25, %v1833_v23 }
0x134e   :  { %v1844_v28 = vmul.f32 0.7978846, %v1842_v27 }
0x1350   :  { %2239 = vtanh.f32 %v1844_v28 }
0x1356   :  { %v2240_v29 = vpop.eup %2239 }
0x1357   :  { %v1848_v30 = vadd.f32 1.0, %v2240_v29 }
0x1359   :  { %v1850_v26 = vmul.f32 0.5, %v1848_v30 }
0x135b   :  { %v1852_v32 = vmul.f32 %v1850_v26, %v1833_v23  ;;  %v2150_v23 = vld [vmem:[#allocation2] ss:$0 sm:$0xff] }
0x135d   :  { %1894 = vmatmul.f32.gmra.mxu2 %v1852_v32 }
0x138f   :  { %v1892_v34 = vpop.f32.mrf.mxu2 }
0x1390   :  { %v1893_v35 = vadd.f32 %v2147_v33, %v1892_v34 }
0x1392   :  { %v1898_v36 = vadd.f32 %v1893_v35, %v2828_v39 }
0x1394   :  { %v1904_v47 = vsel %vm65_vm0, %v1898_v36, 0.0 }
0x1395   :  { %1905 = vadd.xlane.f32.xlu1 %v1904_v47 }
0x13e0   :  { %v1895_v43 = vpop.f32.mrf.mxu2 }
0x13e1   :  { %v1896_v37 = vadd.f32 %v2147_v33, %v1895_v43 }
0x13e3   :  { %v1899_v38 = vadd.f32 %v1896_v37, %v2842_v63  ;;  %v1963_v63 = vld [vmem:[%s2942_s16] sm:$0xff] }
0x13e4   :  { %1989 = vmatpush.msrb.mxu0 %v1963_v63 }
0x13e5   :  { %v1907_v61 = vsel %vm65_vm0, %v1899_v38, 0.0 }
0x13e6   :  { %1908 = vadd.xlane.f32.xlu0 %v1907_v61 }
0x1408   :  { %v1906_v9 = vpop.xlane.xlu1 %1905 }
0x1409   :  { %v1910_v40 = vmul.f32 %v1906_v9, %v2361_v10 }
0x140b   :  { %v1912_v52 = vsub.f32 %v1898_v36, %v1910_v40 }
0x140d   :  { %v1914_v42 = vmul.f32 %v1912_v52, %v1912_v52 }
0x140f   :  { %v1916_v44 = vsel %vm65_vm0, %v1914_v42, 0.0 }
0x1410   :  { %1917 = vadd.xlane.f32.xlu0 %v1916_v44 }
0x1459   :  { %v1909_v48 = vpop.xlane.xlu0 %1908 }
0x145a   :  { %v1911_v39 = vmul.f32 %v1909_v48, %v2361_v10 }
0x145c   :  { %v1913_v49 = vsub.f32 %v1899_v38, %v1911_v39 }
0x145e   :  { %v1915_v50 = vmul.f32 %v1913_v49, %v1913_v49 }
0x1460   :  { %v1919_v53 = vsel %vm65_vm0, %v1915_v50, 0.0 }
0x1461   :  { %1920 = vadd.xlane.f32.xlu2 %v1919_v53 }
0x1483   :  { %v1918_v54 = vpop.xlane.xlu0 %1917 }
0x1484   :  { %v1922_v57 = vmul.f32 %v1918_v54, %v2361_v10 }
0x1486   :  { %v1924_v59 = vadd.f32 1e-12, %v1922_v57 }
0x1488   :  { %2241 = vrsqrt.f32 %v1924_v59  ;;  %vm1932_vm15 = vweird.f32 %v1924_v59 }
0x148e   :  { %v2242_v60 = vpop.eup %2241 }
0x148f   :  { %v1927_v0 = vmul.f32 %v2242_v60, %v1924_v59  ;;  %vm1933_vm14 = vweird.f32 %v2242_v60 }
0x1490   :  { %vm1934_vm1 = vmor %vm1932_vm15, %vm1933_vm14 }
0x1491   :  { %v1928_v5 = vmul.f32 %v2242_v60, %v1927_v0 }
0x1493   :  { %v1929_v7 = vmul.f32 0.5, %v1928_v5 }
0x1495   :  { %v1930_v8 = vsub.f32 1.5, %v1929_v7 }
0x1497   :  { %v1931_v58 = vmul.f32 %v2242_v60, %v1930_v8 }
0x1499   :  { %v1935_v15 = vsel %vm1934_vm1, %v2242_v60, %v1931_v58 }
0x149a   :  { %v1946_v17 = vmul.f32 %v1935_v15, %v1912_v52 }
0x14d4   :  { %v1921_v1 = vpop.xlane.xlu2 %1920 }
0x14d5   :  { %v1923_v3 = vmul.f32 %v1921_v1, %v2361_v10  ;;  %v2148_v10 = vld [vmem:[%s2940_s14 + $0x1] ss:$0 sm:$0xff] }
0x14d6   :  { %v1951_v19 = vmul.f32 %v2148_v10, %v1946_v17 }
0x14d7   :  { %v1925_v6 = vadd.f32 1e-12, %v1923_v3 }
0x14d8   :  { %v1956_v21 = vadd.f32 %v2149_v31, %v1951_v19 }
0x14d9   :  { %2243 = vrsqrt.f32 %v1925_v6  ;;  %vm1942_vm3 = vweird.f32 %v1925_v6 }
0x14df   :  { %v2244_v55 = vpop.eup %2243 }
0x14e0   :  { %v1937_v51 = vmul.f32 %v2244_v55, %v1925_v6  ;;  %vm1943_vm2 = vweird.f32 %v2244_v55 }
0x14e1   :  { %vm1944_vm4 = vmor %vm1942_vm3, %vm1943_vm2 }
0x14e2   :  { %v1938_v13 = vmul.f32 %v2244_v55, %v1937_v51 }
0x14e4   :  { %v1939_v14 = vmul.f32 0.5, %v1938_v13 }
0x14e6   :  { %v1940_v16 = vsub.f32 1.5, %v1939_v14 }
0x14e8   :  { %v1941_v11 = vmul.f32 %v2244_v55, %v1940_v16 }
0x14ea   :  { %v1945_v56 = vsel %vm1944_vm4, %v2244_v55, %v1941_v11 }
0x14eb   :  { %v1947_v18 = vmul.f32 %v1945_v56, %v1913_v49 }
0x14ed   :  { %v1952_v20 = vmul.f32 %v2148_v10, %v1947_v18 }
0x14ef   :  { %v1957_v4 = vadd.f32 %v2149_v31, %v1952_v20 }
0x14f1   :  { %v1959_v12 = vrot.slane %v1957_v4, 7 }
0x14f3   :  { %v1962_v22 = vsel %vm1961_vm5, %v1956_v21, %v1959_v12 }
0x14f4   :  { %2108 = vmatmul.msk.f32.vlgmr.msrb.gmra.mxu0 %vm65_vm0, %v1962_v22 }
0x1571   :  { %v1991_v24 = vpop.f32.mrf.mxu0 }
0x1572   :  { %v1992_v41 = vadd.f32 %v2150_v23, %v1991_v24 }
0x1574   :  { %1995 = vst.msk [vmem:[%s2944_s18] sm:$0x3] %vm1994_vm6, %v1992_v41 }

</bundles_post_ra>
